<compile_context>
chip_gen: v7x
topology: tpu7x:2x2x1
jax: 0.10.0
libtpu: 0.0.40
codegen_flags: <defaults>
</compile_context>

<pallas_src>
import numpy as np
import jax
import jax.numpy as jnp
from jax.experimental import pallas as pl
from jax.experimental.pallas import tpu as pltpu


_GROUP = 8                      # rows per channel group (padded from 6)
_NGROUP = 4                     # field + d/dx + d/dy + d/dz
_ROWS_PER_BEAD = _GROUP * _NGROUP   # 32


# ----------------------------- Pallas kernel ---------------------------------

def _simflux_kernel(inv_ref, coef_ref, x_ref, wtr_ref, wti_ref, out_ref):
    """Fused CZT + PSF reduction + simflux assembly for ALL beads in one step.

    inv  (SMEM, (1,)): 1 / normint
    coef (VMEM, (nb, npat, 8)): per-(bead,pattern) scalars
         [photons*mod_int, mod_int, bg/3, photons*mod_deriv_xyz (3), 0, 0]
    x    (VMEM, (2*nb*32, K)): stacked [real ; imag] pupil channels, per bead
         rows 0..5 field, 8..13 d/dx, 16..21 d/dy, 24..29 d/dz (pads are zero)
    wtr/wti (VMEM, (K, O)): real / imag of (Tx kron Ty)^T combined CZT matrix
    out  (VMEM, (nb, 6*npat, O)): rows [mu(npat) | jac param-major (5*npat)]
    """
    nb = coef_ref.shape[0]
    npat = coef_ref.shape[1]
    rows = nb * _ROWS_PER_BEAD

    x = x_ref[...]                                   # (2*rows, K)
    wtr = wtr_ref[...]
    wti = wti_ref[...]

    # complex CZT as two real matmuls on a stacked [xr; xi] LHS
    p1 = jnp.dot(x, wtr, preferred_element_type=jnp.float32)   # (2*rows, O)
    p2 = jnp.dot(x, wti, preferred_element_type=jnp.float32)
    outr = p1[:rows, :] - p2[rows:, :]               # xr@wtr - xi@wti
    outi = p2[:rows, :] + p1[rows:, :]               # xr@wti + xi@wtr

    inv_n = inv_ref[0]
    c_psf = (1.0 / 3.0) * inv_n
    c_xy = 65.0 * (2.0 / 3.0) * inv_n                # psf_deriv x/y swap scaling
    c_z = 1000.0 * (2.0 / 3.0) * inv_n

    o = out_ref.shape[2]
    bg_plane = jnp.full((npat, o), 1.0 / 3.0, dtype=jnp.float32)

    for b in range(nb):                              # static unroll (nb small)
        base = b * _ROWS_PER_BEAD
        fr = outr[base:base + 8, :]                  # whole-vreg-tile slices
        fi = outi[base:base + 8, :]
        psf = c_psf * jnp.sum(fr * fr + fi * fi, axis=0, keepdims=True)   # (1,O)
        der_x = jnp.sum(fr * outr[base + 8:base + 16, :]
                        + fi * outi[base + 8:base + 16, :], axis=0, keepdims=True)
        der_y = jnp.sum(fr * outr[base + 16:base + 24, :]
                        + fi * outi[base + 16:base + 24, :], axis=0, keepdims=True)
        der_z = jnp.sum(fr * outr[base + 24:base + 32, :]
                        + fi * outi[base + 24:base + 32, :], axis=0, keepdims=True)
        # psf_deriv[..., [1,0]] = psf_deriv[..., [0,1]]*65 ; psf_deriv[..., 2]*=1000
        d0 = c_xy * der_y
        d1 = c_xy * der_x
        d2 = c_z * der_z

        coef = coef_ref[b]                           # (npat, 8)
        a = coef[:, 0:1]                             # photons * mod_intensity
        mint = coef[:, 1:2]                          # mod_intensity
        bg = coef[:, 2:3]                            # bg / 3
        b0 = coef[:, 3:4]                            # photons * mod_deriv_x
        b1 = coef[:, 4:5]
        b2 = coef[:, 5:6]

        # vectorized (npat, O) epilogue, direct ref stores
        out_ref[b, 0:npat, :] = bg + a * psf
        out_ref[b, npat:2 * npat, :] = b0 * psf + a * d0
        out_ref[b, 2 * npat:3 * npat, :] = b1 * psf + a * d1
        out_ref[b, 3 * npat:4 * npat, :] = b2 * psf + a * d2
        out_ref[b, 4 * npat:5 * npat, :] = mint * psf
        out_ref[b, 5 * npat:6 * npat, :] = bg_plane


def _simflux_pallas(inv_n, coef, x, wtr, wti):
    nb, npat, _ = coef.shape
    r2, k = x.shape
    o = wtr.shape[1]
    out_shape = jax.ShapeDtypeStruct((nb, 6 * npat, o), jnp.float32)
    return pl.pallas_call(
        _simflux_kernel,
        out_shape=out_shape,
        grid=(1,),
        in_specs=[
            pl.BlockSpec(memory_space=pltpu.MemorySpace.SMEM),
            pl.BlockSpec((nb, npat, 8), lambda i: (0, 0, 0)),
            pl.BlockSpec((r2, k), lambda i: (0, 0)),
            pl.BlockSpec((k, o), lambda i: (0, 0)),
            pl.BlockSpec((k, o), lambda i: (0, 0)),
        ],
        out_specs=pl.BlockSpec((nb, 6 * npat, o), lambda i: (0, 0, 0)),
    )(inv_n, coef, x, wtr, wti)


# ------------------------------ JAX glue -------------------------------------

def _czt_matrix(n, m, l, a_vec, b_vec, d_vec):
    """Dense matrix equivalent of: out = B * ifft(D * fft(pad_L(A*x)))[:M]."""
    ll = jnp.arange(l)
    fwd = jnp.exp(-2j * jnp.pi * jnp.outer(ll, jnp.arange(n)) / l)      # (L, N)
    inv = jnp.exp(2j * jnp.pi * jnp.outer(jnp.arange(m), ll) / l) / l   # (M, L)
    t = b_vec[:, None] * (inv @ (d_vec[:, None] * fwd)) * a_vec[None, :]
    return t.astype(jnp.complex64)


def precompute_czt_weights(N, M, L, Ax, Bx, Dx, Ay, By, Dy, Mx, My, Npupil):
    """Static (per-configuration) CZT transform matrices (real, imag)."""
    tx = _czt_matrix(N, M, L, Ax, Bx, Dx)       # (Mx, Np)
    ty = _czt_matrix(N, M, L, Ay, By, Dy)       # (My, Np)
    w = jnp.einsum('ai,bj->abij', tx, ty).reshape(Mx * My, Npupil * Npupil)
    wt = jnp.swapaxes(w, 0, 1)                  # (Np*Np, Mx*My)
    wtr = jnp.real(wt).astype(jnp.float32)
    wti = jnp.imag(wt).astype(jnp.float32)
    return wtr, wti


def _common(roisize, pixelsize, NA, Lambda, Npupil, thetatry, wavevector,
            PupilMatrix, mod, roipos):
    photons = thetatry[:, 3]
    bg = thetatry[:, 4] / 3.0
    xy = jnp.stack([thetatry[:, 1], thetatry[:, 0]], axis=-1)
    xy = (xy - roisize / 2.0) * pixelsize
    z = thetatry[:, 2] * 1000.0
    xyz = jnp.concatenate([xy, z[:, None]], axis=-1)

    # position phase mask + pupil functions (small elementwise complex glue)
    kx = wavevector[:, :, 0]
    ky = wavevector[:, :, 1]
    kz = wavevector[:, :, 2]
    wpos = (xyz[:, 0][:, None, None] * kx[None]
            + xyz[:, 1][:, None, None] * ky[None]
            + xyz[:, 2][:, None, None] * kz[None])
    ppm = jnp.exp(-1j * wpos)                                   # (nb, Np, Np)
    pf = ppm[:, :, :, None, None] * PupilMatrix[None]           # (nb, Np, Np, 2, 3)
    pfd = (-1j) * wavevector[None, :, :, :, None, None] * pf[:, :, :, None, :, :]

    # get_normalization (tiny reduction)
    dxy = 2.0 * NA / Lambda / Npupil
    normfac = dxy ** 2 / pixelsize ** 2
    normint_free = normfac * jnp.sum(jnp.abs(PupilMatrix) ** 2) / 3.0

    # sf_modulation (per-bead scalar math)
    xyz_in = thetatry[:, :3]
    kvec = mod[:, :, :3]
    phase = mod[:, :, 4]
    depth = mod[:, :, 3]
    relint = mod[:, :, 5]
    xyz_mod = xyz_in.at[:, :2].set(roipos + xyz_in[:, :2])
    em_phase = jnp.mod(jnp.sum(xyz_mod[:, None, :] * kvec, -1), 2 * jnp.pi) - phase
    mod_deriv = depth[:, :, None] * kvec * jnp.cos(em_phase)[:, :, None] * relint[:, :, None]
    mod_intensity = (1.0 + depth * jnp.sin(em_phase)) * relint
    return photons, bg, pf, pfd, normint_free, mod_intensity, mod_deriv


def model_vectorial_psf_simflux_forward(*, roisize, NA, Lambda, Npupil, pixelsize,
                                        N, M, L, Ax, Bx, Dx, Ay, By, Dy, Mx, My,
                                        thetatry, zstack, wavevector, PupilMatrix,
                                        mod, roipos, czt_weights=None,
                                        **unused_inputs):
    # TODO(synk): zstack=True branch (per-z-slice loop + in-graph pupil recompute)
    # has no clean Pallas mapping here and is not implemented.
    assert not zstack
    photons, bg, pf, pfd, normint, mint, mderiv = _common(
        roisize, pixelsize, NA, Lambda, Npupil, thetatry, wavevector,
        PupilMatrix, mod, roipos)
    nb = thetatry.shape[0]
    npat = mod.shape[1]
    npx = Npupil
    k_dim = npx * npx

    # combined 2-D CZT transform matrix: static -> precompute once and pass in.
    if czt_weights is None:
        czt_weights = precompute_czt_weights(N, M, L, Ax, Bx, Dx, Ay, By, Dy,
                                             Mx, My, Npupil)
    wtr, wti = czt_weights

    # channel-major pupil functions; each 6-row group padded to 8 rows so the
    # kernel's reduction slices are whole (8,128) sublane tiles.
    xf = jnp.transpose(pf, (0, 3, 4, 1, 2)).reshape(nb, 1, 6, k_dim)
    xd = jnp.transpose(pfd, (0, 3, 4, 5, 1, 2)).reshape(nb, 3, 6, k_dim)
    groups = jnp.concatenate([xf, xd], axis=1)                  # (nb, 4, 6, K)
    groups = jnp.pad(groups, ((0, 0), (0, 0), (0, _GROUP - 6), (0, 0)))
    xc = groups.reshape(nb * _ROWS_PER_BEAD, k_dim)             # (nb*32, K)
    xr = jnp.real(xc).astype(jnp.float32)
    xi = jnp.imag(xc).astype(jnp.float32)
    x = jnp.concatenate([xr, xi], axis=0)                       # (2*nb*32, K)

    # per-(bead, pattern) scalar coefficients for the fused assembly epilogue
    a = photons[:, None] * mint                                 # (nb, npat)
    bvec = photons[:, None, None] * mderiv                      # (nb, npat, 3)
    bgc = jnp.broadcast_to(bg[:, None], a.shape)
    coef = jnp.stack([a, mint, bgc, bvec[..., 0], bvec[..., 1], bvec[..., 2],
                      jnp.zeros_like(a), jnp.zeros_like(a)],
                     axis=-1).astype(jnp.float32)                # (nb, npat, 8)
    inv_n = jnp.reshape(1.0 / normint, (1,)).astype(jnp.float32)

    out = _simflux_pallas(inv_n, coef, x, wtr, wti)             # (nb, 6*npat, O)
    mu = out[:, :npat, :].reshape(nb, npat, Mx, My)
    full_jacobian = jnp.transpose(
        out[:, npat:, :].reshape(nb, 5, npat, Mx, My), (0, 2, 3, 4, 1))
    return mu, full_jacobian


# ------------------------ pure-JAX FFT reference ------------------------------

def _czt_apply_ref(datain, a_vec, b_vec, d_vec, n, m, l):
    sh = datain.shape
    tail = (1,) * (len(sh) - 3)
    cztin = jnp.zeros(sh[:2] + (l,) + sh[3:], dtype=jnp.complex64)
    cztin = cztin.at[:, :, :n].set(a_vec.reshape((1, 1, n) + tail) * datain)
    temp = d_vec.reshape((1, 1, l) + tail) * jnp.fft.fft(cztin, axis=2)
    cztout = jnp.fft.ifft(temp, axis=2)
    dataout = b_vec.reshape((1, 1, m) + tail) * cztout[:, :, :m]
    return jnp.swapaxes(dataout, 1, 2)


def forward_reference(*, roisize, NA, Lambda, Npupil, pixelsize, N, M, L,
                      Ax, Bx, Dx, Ay, By, Dy, Mx, My, thetatry, zstack,
                      wavevector, PupilMatrix, mod, roipos, **unused_inputs):
    assert not zstack
    photons, bg, pf, pfd, normint, mint, mderiv = _common(
        roisize, pixelsize, NA, Lambda, Npupil, thetatry, wavevector,
        PupilMatrix, mod, roipos)
    field = _czt_apply_ref(_czt_apply_ref(pf, Ay, By, Dy, N, M, L),
                           Ax, Bx, Dx, N, M, L)                 # (nb,Mx,My,2,3)
    field_d = _czt_apply_ref(_czt_apply_ref(pfd, Ay, By, Dy, N, M, L),
                             Ax, Bx, Dx, N, M, L)               # (nb,Mx,My,3,2,3)
    psf = jnp.sum(jnp.abs(field) ** 2, axis=(-1, -2)) / 3.0 / normint
    tmp = jnp.transpose(field_d, (0, 1, 2, 4, 5, 3))
    psfder = (2.0 / 3.0) * jnp.sum(jnp.real(jnp.conj(field)[..., None] * tmp),
                                   axis=(-2, -3)) / normint      # (nb,Mx,My,3)
    psfder_s = jnp.stack([psfder[..., 1] * 65.0, psfder[..., 0] * 65.0,
                          psfder[..., 2] * 1000.0], axis=-1)
    phot = photons[:, None, None, None]
    mu = bg[:, None, None, None] + mint[:, :, None, None] * phot * psf[:, None]
    deriv_xyz = phot[..., None] * (mderiv[:, :, None, None, :] * psf[:, None, ..., None]
                                   + mint[:, :, None, None, None] * psfder_s[:, None])
    deriv_i = psf[:, None] * mint[:, :, None, None]
    deriv_bg = jnp.ones_like(deriv_i) / 3.0
    jac = jnp.concatenate([deriv_xyz, deriv_i[..., None], deriv_bg[..., None]], -1)
    return mu, jac


# --------------------------------- main ---------------------------------------

if __name__ == "__main__":
    NB, NPAT = 2, 3
    ROISIZE = 16
    MX = MY = ROISIZE
    NPUPIL = 16
    N_, M_, L_ = NPUPIL, MX, NPUPIL + MX
    NA = 1.33
    LAMBDA = 640.0
    PIXELSIZE = 65.0
    REFMED, REFCOV, REFIMM, REFIMMNOM = 1.33, 1.52, 1.52, 1.52
    ZMIN, ZMAX, K_ = -300.0, 300.0, 4
    NUMPARAMS = 5

    key = jax.random.PRNGKey(0)
    keys = jax.random.split(key, 16)

    # pupil grid + physically-scaled wavevectors (forward-pass inputs)
    dxy = 2.0 / NPUPIL
    xy_pup = (jnp.arange(NPUPIL) + 0.5) * dxy - 1.0
    ypup, xpup = jnp.meshgrid(xy_pup, xy_pup, indexing="xy")
    rho2 = xpup ** 2 + ypup ** 2
    costheta_med = jnp.sqrt((1.0 - rho2 * NA ** 2 / REFMED ** 2).astype(jnp.complex64))
    costheta_imm = jnp.sqrt((1.0 - rho2 * NA ** 2 / REFIMM ** 2).astype(jnp.complex64))
    wavevector = jnp.stack([
        (2 * jnp.pi * NA / LAMBDA * xpup).astype(jnp.complex64),
        (2 * jnp.pi * NA / LAMBDA * ypup).astype(jnp.complex64),
        (2 * jnp.pi * REFMED / LAMBDA) * costheta_med,
    ], axis=-1)
    wavevectorzimm = (2 * jnp.pi * REFIMM / LAMBDA) * costheta_imm

    aperture = (rho2 < 1.0).astype(jnp.float32)
    pm_r = jax.random.normal(keys[0], (NPUPIL, NPUPIL, 2, 3))
    pm_i = jax.random.normal(keys[1], (NPUPIL, NPUPIL, 2, 3))
    PupilMatrix = (aperture[:, :, None, None] * 0.3 * (pm_r + 1j * pm_i)).astype(jnp.complex64)

    def unit_phase(k, n):
        ph = jax.random.uniform(k, (n,), minval=0.0, maxval=2 * np.pi)
        return jnp.exp(1j * ph).astype(jnp.complex64)

    Ax = unit_phase(keys[2], N_); Bx = unit_phase(keys[3], M_); Dx = unit_phase(keys[4], L_)
    Ay = unit_phase(keys[5], N_); By = unit_phase(keys[6], M_); Dy = unit_phase(keys[7], L_)

    thetatry = jnp.stack([
        ROISIZE / 2 + jax.random.uniform(keys[8], (NB,), minval=-1.0, maxval=1.0),
        ROISIZE / 2 + jax.random.uniform(keys[9], (NB,), minval=-1.0, maxval=1.0),
        jax.random.uniform(keys[10], (NB,), minval=-0.2, maxval=0.2),
        1000.0 + 100.0 * jax.random.uniform(keys[11], (NB,)),
        2.0 + jax.random.uniform(keys[12], (NB,)),
    ], axis=-1).astype(jnp.float32)

    mod = jnp.concatenate([
        jax.random.uniform(keys[13], (NB, NPAT, 3), minval=-0.05, maxval=0.05),
        jnp.full((NB, NPAT, 1), 0.9),
        jax.random.uniform(keys[14], (NB, NPAT, 1), minval=0.0, maxval=2 * np.pi),
        jnp.full((NB, NPAT, 1), 1.0 / NPAT),
    ], axis=-1).astype(jnp.float32)
    roipos = jax.random.uniform(keys[15], (NB, 2), minval=0.0, maxval=10.0).astype(jnp.float32)

    # unused by the zstack=False path, kept for interface fidelity
    zvals = jnp.zeros((3,), jnp.float32)
    abberations = jnp.array([[2., -2., 30.], [2., 2., 20.], [3., -1., 10.],
                             [3., 1., 5.], [4., 0., 12.]], jnp.float32)
    all_zernikes = jnp.zeros((NPUPIL, NPUPIL, abberations.shape[0]), jnp.float32)
    smp = jnp.zeros((NB, NPAT, MX, MY), jnp.float32)

    args = dict(roisize=ROISIZE, NA=NA, zvals=zvals, refmed=REFMED, refcov=REFCOV,
                refimm=REFIMM, refimmnom=REFIMMNOM, Lambda=LAMBDA, Npupil=NPUPIL,
                abberations=abberations, zmin=ZMIN, zmax=ZMAX, K=K_, N=N_, M=M_, L=L_,
                Ax=Ax, Bx=Bx, Dx=Dx, Ay=Ay, pixelsize=PIXELSIZE, By=By, Dy=Dy,
                Mx=MX, My=MY, numparams_fit=NUMPARAMS, thetatry=thetatry,
                zstack=False, wavevector=wavevector, wavevectorzimm=wavevectorzimm,
                all_zernikes=all_zernikes, PupilMatrix=PupilMatrix,
                mod=mod, roipos=roipos, smp=smp)

    # hoisted (static-parameter-only) CZT matrix construction
    czt_w = precompute_czt_weights(N_, M_, L_, Ax, Bx, Dx, Ay, By, Dy,
                                   MX, MY, NPUPIL)
    jax.block_until_ready(czt_w)

    mu, jac = model_vectorial_psf_simflux_forward(czt_weights=czt_w, **args)
    jax.block_until_ready((mu, jac))

    mu_ref, jac_ref = forward_reference(**args)
    jax.block_until_ready((mu_ref, jac_ref))

    assert mu.shape == (NB, NPAT, MX, MY) and mu.dtype == jnp.float32
    assert jac.shape == (NB, NPAT, MX, MY, 5) and jac.dtype == jnp.float32
    assert bool(jnp.all(jnp.isfinite(mu))) and bool(jnp.all(jnp.isfinite(jac)))

    def rel_err(a, b):
        return float(jnp.linalg.norm((a - b).ravel())
                     / (jnp.linalg.norm(b.ravel()) + 1e-30))

    assert rel_err(mu, mu_ref) < 1e-3, ("mu mismatch", rel_err(mu, mu_ref))
    assert rel_err(jac, jac_ref) < 1e-3, ("jac mismatch", rel_err(jac, jac_ref))

    print("KERNEL_OK")
</pallas_src>

<mosaic_0001>
module attributes {stable_mosaic.version = 11 : i64} {
  func.func @_simflux_kernel(%arg0: i32, %arg1: memref<1xf32, #tpu.memory_space<smem>>, %arg2: memref<2x3x8xf32, #tpu.memory_space<vmem>>, %arg3: memref<128x256xf32, #tpu.memory_space<vmem>>, %arg4: memref<256x256xf32, #tpu.memory_space<vmem>>, %arg5: memref<256x256xf32, #tpu.memory_space<vmem>>, %arg6: memref<2x18x256xf32, #tpu.memory_space<vmem>>) attributes {dimension_semantics = [#tpu.dimension_semantics<arbitrary>], iteration_bounds = array<i64: 1>, scalar_prefetch = 0 : i64, scratch_operands = 0 : i64, tpu.core_type = #tpu.core_type<tc>, window_params = [{transform_indices = @transform_0, window_bounds = array<i64: 1>}, {pipeline_mode = #tpu.pipeline_mode<synchronous>, transform_indices = @transform_1, window_bounds = array<i64: 2, 3, 8>}, {pipeline_mode = #tpu.pipeline_mode<synchronous>, transform_indices = @transform_2, window_bounds = array<i64: 128, 256>}, {pipeline_mode = #tpu.pipeline_mode<synchronous>, transform_indices = @transform_3, window_bounds = array<i64: 256, 256>}, {pipeline_mode = #tpu.pipeline_mode<synchronous>, transform_indices = @transform_4, window_bounds = array<i64: 256, 256>}, {pipeline_mode = #tpu.pipeline_mode<synchronous>, transform_indices = @transform_5, window_bounds = array<i64: 2, 18, 256>}]} {
    %c0 = arith.constant 0 : index
    %c0_0 = arith.constant 0 : index
    %0 = vector.load %arg3[%c0, %c0_0] : memref<128x256xf32, #tpu.memory_space<vmem>>, vector<128x256xf32>
    %c0_1 = arith.constant 0 : index
    %c0_2 = arith.constant 0 : index
    %1 = vector.load %arg4[%c0_1, %c0_2] : memref<256x256xf32, #tpu.memory_space<vmem>>, vector<256x256xf32>
    %c0_3 = arith.constant 0 : index
    %c0_4 = arith.constant 0 : index
    %2 = vector.load %arg5[%c0_3, %c0_4] : memref<256x256xf32, #tpu.memory_space<vmem>>, vector<256x256xf32>
    %cst = arith.constant dense<0.000000e+00> : vector<128x256xf32>
    %3 = tpu.matmul %0, %1, %cst {dimension_numbers = #tpu.dot_dimension_numbers<[1], [0], [0], [1], [0, 0, 1, 1], [], []>} : vector<128x256xf32>, vector<256x256xf32>, vector<128x256xf32> -> vector<128x256xf32>
    %cst_5 = arith.constant dense<0.000000e+00> : vector<128x256xf32>
    %4 = tpu.matmul %0, %2, %cst_5 {dimension_numbers = #tpu.dot_dimension_numbers<[1], [0], [0], [1], [0, 0, 1, 1], [], []>} : vector<128x256xf32>, vector<256x256xf32>, vector<128x256xf32> -> vector<128x256xf32>
    %5 = vector.extract_strided_slice %3 {offsets = [0, 0], sizes = [64, 256], strides = [1, 1]} : vector<128x256xf32> to vector<64x256xf32>
    %6 = vector.extract_strided_slice %4 {offsets = [64, 0], sizes = [64, 256], strides = [1, 1]} : vector<128x256xf32> to vector<64x256xf32>
    %7 = arith.subf %5, %6 : vector<64x256xf32>
    %8 = vector.extract_strided_slice %4 {offsets = [0, 0], sizes = [64, 256], strides = [1, 1]} : vector<128x256xf32> to vector<64x256xf32>
    %9 = vector.extract_strided_slice %3 {offsets = [64, 0], sizes = [64, 256], strides = [1, 1]} : vector<128x256xf32> to vector<64x256xf32>
    %10 = arith.addf %8, %9 : vector<64x256xf32>
    %c0_6 = arith.constant 0 : index
    %11 = memref.load %arg1[%c0_6] : memref<1xf32, #tpu.memory_space<smem>>
    %cst_7 = arith.constant 0.333333343 : f32
    %12 = arith.mulf %cst_7, %11 : f32
    %cst_8 = arith.constant 43.3333321 : f32
    %13 = arith.mulf %cst_8, %11 : f32
    %cst_9 = arith.constant 666.666687 : f32
    %14 = arith.mulf %cst_9, %11 : f32
    %cst_10 = arith.constant 0.333333343 : f32
    %15 = vector.broadcast %cst_10 : f32 to vector<3x256xf32>
    %16 = vector.extract_strided_slice %7 {offsets = [0, 0], sizes = [8, 256], strides = [1, 1]} : vector<64x256xf32> to vector<8x256xf32>
    %17 = vector.extract_strided_slice %10 {offsets = [0, 0], sizes = [8, 256], strides = [1, 1]} : vector<64x256xf32> to vector<8x256xf32>
    %18 = arith.mulf %16, %16 : vector<8x256xf32>
    %19 = arith.mulf %17, %17 : vector<8x256xf32>
    %20 = arith.addf %18, %19 : vector<8x256xf32>
    %cst_11 = arith.constant dense<0.000000e+00> : vector<256xf32>
    %21 = vector.multi_reduction <add>, %20, %cst_11 [0] : vector<8x256xf32> to vector<256xf32>
    %22 = vector.shape_cast %21 : vector<256xf32> to vector<1x256xf32>
    %23 = vector.broadcast %12 : f32 to vector<1x256xf32>
    %24 = arith.mulf %23, %22 : vector<1x256xf32>
    %25 = vector.extract_strided_slice %7 {offsets = [8, 0], sizes = [8, 256], strides = [1, 1]} : vector<64x256xf32> to vector<8x256xf32>
    %26 = arith.mulf %16, %25 : vector<8x256xf32>
    %27 = vector.extract_strided_slice %10 {offsets = [8, 0], sizes = [8, 256], strides = [1, 1]} : vector<64x256xf32> to vector<8x256xf32>
    %28 = arith.mulf %17, %27 : vector<8x256xf32>
    %29 = arith.addf %26, %28 : vector<8x256xf32>
    %cst_12 = arith.constant dense<0.000000e+00> : vector<256xf32>
    %30 = vector.multi_reduction <add>, %29, %cst_12 [0] : vector<8x256xf32> to vector<256xf32>
    %31 = vector.shape_cast %30 : vector<256xf32> to vector<1x256xf32>
    %32 = vector.extract_strided_slice %7 {offsets = [16, 0], sizes = [8, 256], strides = [1, 1]} : vector<64x256xf32> to vector<8x256xf32>
    %33 = arith.mulf %16, %32 : vector<8x256xf32>
    %34 = vector.extract_strided_slice %10 {offsets = [16, 0], sizes = [8, 256], strides = [1, 1]} : vector<64x256xf32> to vector<8x256xf32>
    %35 = arith.mulf %17, %34 : vector<8x256xf32>
    %36 = arith.addf %33, %35 : vector<8x256xf32>
    %cst_13 = arith.constant dense<0.000000e+00> : vector<256xf32>
    %37 = vector.multi_reduction <add>, %36, %cst_13 [0] : vector<8x256xf32> to vector<256xf32>
    %38 = vector.shape_cast %37 : vector<256xf32> to vector<1x256xf32>
    %39 = vector.extract_strided_slice %7 {offsets = [24, 0], sizes = [8, 256], strides = [1, 1]} : vector<64x256xf32> to vector<8x256xf32>
    %40 = arith.mulf %16, %39 : vector<8x256xf32>
    %41 = vector.extract_strided_slice %10 {offsets = [24, 0], sizes = [8, 256], strides = [1, 1]} : vector<64x256xf32> to vector<8x256xf32>
    %42 = arith.mulf %17, %41 : vector<8x256xf32>
    %43 = arith.addf %40, %42 : vector<8x256xf32>
    %cst_14 = arith.constant dense<0.000000e+00> : vector<256xf32>
    %44 = vector.multi_reduction <add>, %43, %cst_14 [0] : vector<8x256xf32> to vector<256xf32>
    %45 = vector.shape_cast %44 : vector<256xf32> to vector<1x256xf32>
    %46 = vector.broadcast %13 : f32 to vector<1x256xf32>
    %47 = arith.mulf %46, %38 : vector<1x256xf32>
    %48 = vector.broadcast %13 : f32 to vector<1x256xf32>
    %49 = arith.mulf %48, %31 : vector<1x256xf32>
    %50 = vector.broadcast %14 : f32 to vector<1x256xf32>
    %51 = arith.mulf %50, %45 : vector<1x256xf32>
    %c0_15 = arith.constant 0 : index
    %c0_16 = arith.constant 0 : index
    %c0_17 = arith.constant 0 : index
    %52 = vector.load %arg2[%c0_15, %c0_16, %c0_17] : memref<2x3x8xf32, #tpu.memory_space<vmem>>, vector<1x3x8xf32>
    %53 = vector.shape_cast %52 : vector<1x3x8xf32> to vector<3x8xf32>
    %54 = vector.extract_strided_slice %53 {offsets = [0, 0], sizes = [3, 1], strides = [1, 1]} : vector<3x8xf32> to vector<3x1xf32>
    %55 = vector.extract_strided_slice %53 {offsets = [0, 1], sizes = [3, 1], strides = [1, 1]} : vector<3x8xf32> to vector<3x1xf32>
    %56 = vector.extract_strided_slice %53 {offsets = [0, 2], sizes = [3, 1], strides = [1, 1]} : vector<3x8xf32> to vector<3x1xf32>
    %57 = vector.extract_strided_slice %53 {offsets = [0, 3], sizes = [3, 1], strides = [1, 1]} : vector<3x8xf32> to vector<3x1xf32>
    %58 = vector.extract_strided_slice %53 {offsets = [0, 4], sizes = [3, 1], strides = [1, 1]} : vector<3x8xf32> to vector<3x1xf32>
    %59 = vector.extract_strided_slice %53 {offsets = [0, 5], sizes = [3, 1], strides = [1, 1]} : vector<3x8xf32> to vector<3x1xf32>
    %60 = vector.broadcast %54 : vector<3x1xf32> to vector<3x256xf32>
    %61 = vector.broadcast %24 : vector<1x256xf32> to vector<3x256xf32>
    %62 = arith.mulf %60, %61 : vector<3x256xf32>
    %63 = vector.broadcast %56 : vector<3x1xf32> to vector<3x256xf32>
    %64 = arith.addf %63, %62 : vector<3x256xf32>
    %c0_18 = arith.constant 0 : index
    %c0_19 = arith.constant 0 : index
    %c0_20 = arith.constant 0 : index
    %65 = vector.load %arg6[%c0_18, %c0_19, %c0_20] : memref<2x18x256xf32, #tpu.memory_space<vmem>>, vector<1x3x256xf32>
    %66 = vector.shape_cast %65 : vector<1x3x256xf32> to vector<3x256xf32>
    %67 = vector.shape_cast %64 : vector<3x256xf32> to vector<1x3x256xf32>
    tpu.vector_store %arg6[%c0_18, %c0_19, %c0_20], %67 {strides = array<i32>} : memref<2x18x256xf32, #tpu.memory_space<vmem>>, vector<1x3x256xf32>,
    %68 = vector.broadcast %57 : vector<3x1xf32> to vector<3x256xf32>
    %69 = vector.broadcast %24 : vector<1x256xf32> to vector<3x256xf32>
    %70 = arith.mulf %68, %69 : vector<3x256xf32>
    %71 = vector.broadcast %54 : vector<3x1xf32> to vector<3x256xf32>
    %72 = vector.broadcast %47 : vector<1x256xf32> to vector<3x256xf32>
    %73 = arith.mulf %71, %72 : vector<3x256xf32>
    %74 = arith.addf %70, %73 : vector<3x256xf32>
    %c0_21 = arith.constant 0 : index
    %c3 = arith.constant 3 : index
    %c0_22 = arith.constant 0 : index
    %75 = vector.load %arg6[%c0_21, %c3, %c0_22] : memref<2x18x256xf32, #tpu.memory_space<vmem>>, vector<1x3x256xf32>
    %76 = vector.shape_cast %75 : vector<1x3x256xf32> to vector<3x256xf32>
    %77 = vector.shape_cast %74 : vector<3x256xf32> to vector<1x3x256xf32>
    tpu.vector_store %arg6[%c0_21, %c3, %c0_22], %77 {strides = array<i32>} : memref<2x18x256xf32, #tpu.memory_space<vmem>>, vector<1x3x256xf32>,
    %78 = vector.broadcast %58 : vector<3x1xf32> to vector<3x256xf32>
    %79 = vector.broadcast %24 : vector<1x256xf32> to vector<3x256xf32>
    %80 = arith.mulf %78, %79 : vector<3x256xf32>
    %81 = vector.broadcast %54 : vector<3x1xf32> to vector<3x256xf32>
    %82 = vector.broadcast %49 : vector<1x256xf32> to vector<3x256xf32>
    %83 = arith.mulf %81, %82 : vector<3x256xf32>
    %84 = arith.addf %80, %83 : vector<3x256xf32>
    %c0_23 = arith.constant 0 : index
    %c6 = arith.constant 6 : index
    %c0_24 = arith.constant 0 : index
    %85 = vector.load %arg6[%c0_23, %c6, %c0_24] : memref<2x18x256xf32, #tpu.memory_space<vmem>>, vector<1x3x256xf32>
    %86 = vector.shape_cast %85 : vector<1x3x256xf32> to vector<3x256xf32>
    %87 = vector.shape_cast %84 : vector<3x256xf32> to vector<1x3x256xf32>
    tpu.vector_store %arg6[%c0_23, %c6, %c0_24], %87 {strides = array<i32>} : memref<2x18x256xf32, #tpu.memory_space<vmem>>, vector<1x3x256xf32>,
    %88 = vector.broadcast %59 : vector<3x1xf32> to vector<3x256xf32>
    %89 = vector.broadcast %24 : vector<1x256xf32> to vector<3x256xf32>
    %90 = arith.mulf %88, %89 : vector<3x256xf32>
    %91 = vector.broadcast %54 : vector<3x1xf32> to vector<3x256xf32>
    %92 = vector.broadcast %51 : vector<1x256xf32> to vector<3x256xf32>
    %93 = arith.mulf %91, %92 : vector<3x256xf32>
    %94 = arith.addf %90, %93 : vector<3x256xf32>
    %c0_25 = arith.constant 0 : index
    %c9 = arith.constant 9 : index
    %c0_26 = arith.constant 0 : index
    %95 = vector.load %arg6[%c0_25, %c9, %c0_26] : memref<2x18x256xf32, #tpu.memory_space<vmem>>, vector<1x3x256xf32>
    %96 = vector.shape_cast %95 : vector<1x3x256xf32> to vector<3x256xf32>
    %97 = vector.shape_cast %94 : vector<3x256xf32> to vector<1x3x256xf32>
    tpu.vector_store %arg6[%c0_25, %c9, %c0_26], %97 {strides = array<i32>} : memref<2x18x256xf32, #tpu.memory_space<vmem>>, vector<1x3x256xf32>,
    %98 = vector.broadcast %55 : vector<3x1xf32> to vector<3x256xf32>
    %99 = vector.broadcast %24 : vector<1x256xf32> to vector<3x256xf32>
    %100 = arith.mulf %98, %99 : vector<3x256xf32>
    %c0_27 = arith.constant 0 : index
    %c12 = arith.constant 12 : index
    %c0_28 = arith.constant 0 : index
    %101 = vector.load %arg6[%c0_27, %c12, %c0_28] : memref<2x18x256xf32, #tpu.memory_space<vmem>>, vector<1x3x256xf32>
    %102 = vector.shape_cast %101 : vector<1x3x256xf32> to vector<3x256xf32>
    %103 = vector.shape_cast %100 : vector<3x256xf32> to vector<1x3x256xf32>
    tpu.vector_store %arg6[%c0_27, %c12, %c0_28], %103 {strides = array<i32>} : memref<2x18x256xf32, #tpu.memory_space<vmem>>, vector<1x3x256xf32>,
    %c0_29 = arith.constant 0 : index
    %c15 = arith.constant 15 : index
    %c0_30 = arith.constant 0 : index
    %104 = vector.load %arg6[%c0_29, %c15, %c0_30] : memref<2x18x256xf32, #tpu.memory_space<vmem>>, vector<1x3x256xf32>
    %105 = vector.shape_cast %104 : vector<1x3x256xf32> to vector<3x256xf32>
    %106 = vector.shape_cast %15 : vector<3x256xf32> to vector<1x3x256xf32>
    tpu.vector_store %arg6[%c0_29, %c15, %c0_30], %106 {strides = array<i32>} : memref<2x18x256xf32, #tpu.memory_space<vmem>>, vector<1x3x256xf32>,
    %107 = vector.extract_strided_slice %7 {offsets = [32, 0], sizes = [8, 256], strides = [1, 1]} : vector<64x256xf32> to vector<8x256xf32>
    %108 = vector.extract_strided_slice %10 {offsets = [32, 0], sizes = [8, 256], strides = [1, 1]} : vector<64x256xf32> to vector<8x256xf32>
    %109 = arith.mulf %107, %107 : vector<8x256xf32>
    %110 = arith.mulf %108, %108 : vector<8x256xf32>
    %111 = arith.addf %109, %110 : vector<8x256xf32>
    %cst_31 = arith.constant dense<0.000000e+00> : vector<256xf32>
    %112 = vector.multi_reduction <add>, %111, %cst_31 [0] : vector<8x256xf32> to vector<256xf32>
    %113 = vector.shape_cast %112 : vector<256xf32> to vector<1x256xf32>
    %114 = vector.broadcast %12 : f32 to vector<1x256xf32>
    %115 = arith.mulf %114, %113 : vector<1x256xf32>
    %116 = vector.extract_strided_slice %7 {offsets = [40, 0], sizes = [8, 256], strides = [1, 1]} : vector<64x256xf32> to vector<8x256xf32>
    %117 = arith.mulf %107, %116 : vector<8x256xf32>
    %118 = vector.extract_strided_slice %10 {offsets = [40, 0], sizes = [8, 256], strides = [1, 1]} : vector<64x256xf32> to vector<8x256xf32>
    %119 = arith.mulf %108, %118 : vector<8x256xf32>
    %120 = arith.addf %117, %119 : vector<8x256xf32>
    %cst_32 = arith.constant dense<0.000000e+00> : vector<256xf32>
    %121 = vector.multi_reduction <add>, %120, %cst_32 [0] : vector<8x256xf32> to vector<256xf32>
    %122 = vector.shape_cast %121 : vector<256xf32> to vector<1x256xf32>
    %123 = vector.extract_strided_slice %7 {offsets = [48, 0], sizes = [8, 256], strides = [1, 1]} : vector<64x256xf32> to vector<8x256xf32>
    %124 = arith.mulf %107, %123 : vector<8x256xf32>
    %125 = vector.extract_strided_slice %10 {offsets = [48, 0], sizes = [8, 256], strides = [1, 1]} : vector<64x256xf32> to vector<8x256xf32>
    %126 = arith.mulf %108, %125 : vector<8x256xf32>
    %127 = arith.addf %124, %126 : vector<8x256xf32>
    %cst_33 = arith.constant dense<0.000000e+00> : vector<256xf32>
    %128 = vector.multi_reduction <add>, %127, %cst_33 [0] : vector<8x256xf32> to vector<256xf32>
    %129 = vector.shape_cast %128 : vector<256xf32> to vector<1x256xf32>
    %130 = vector.extract_strided_slice %7 {offsets = [56, 0], sizes = [8, 256], strides = [1, 1]} : vector<64x256xf32> to vector<8x256xf32>
    %131 = arith.mulf %107, %130 : vector<8x256xf32>
    %132 = vector.extract_strided_slice %10 {offsets = [56, 0], sizes = [8, 256], strides = [1, 1]} : vector<64x256xf32> to vector<8x256xf32>
    %133 = arith.mulf %108, %132 : vector<8x256xf32>
    %134 = arith.addf %131, %133 : vector<8x256xf32>
    %cst_34 = arith.constant dense<0.000000e+00> : vector<256xf32>
    %135 = vector.multi_reduction <add>, %134, %cst_34 [0] : vector<8x256xf32> to vector<256xf32>
    %136 = vector.shape_cast %135 : vector<256xf32> to vector<1x256xf32>
    %137 = vector.broadcast %13 : f32 to vector<1x256xf32>
    %138 = arith.mulf %137, %129 : vector<1x256xf32>
    %139 = vector.broadcast %13 : f32 to vector<1x256xf32>
    %140 = arith.mulf %139, %122 : vector<1x256xf32>
    %141 = vector.broadcast %14 : f32 to vector<1x256xf32>
    %142 = arith.mulf %141, %136 : vector<1x256xf32>
    %c1 = arith.constant 1 : index
    %c0_35 = arith.constant 0 : index
    %c0_36 = arith.constant 0 : index
    %143 = vector.load %arg2[%c1, %c0_35, %c0_36] : memref<2x3x8xf32, #tpu.memory_space<vmem>>, vector<1x3x8xf32>
    %144 = vector.shape_cast %143 : vector<1x3x8xf32> to vector<3x8xf32>
    %145 = vector.extract_strided_slice %144 {offsets = [0, 0], sizes = [3, 1], strides = [1, 1]} : vector<3x8xf32> to vector<3x1xf32>
    %146 = vector.extract_strided_slice %144 {offsets = [0, 1], sizes = [3, 1], strides = [1, 1]} : vector<3x8xf32> to vector<3x1xf32>
    %147 = vector.extract_strided_slice %144 {offsets = [0, 2], sizes = [3, 1], strides = [1, 1]} : vector<3x8xf32> to vector<3x1xf32>
    %148 = vector.extract_strided_slice %144 {offsets = [0, 3], sizes = [3, 1], strides = [1, 1]} : vector<3x8xf32> to vector<3x1xf32>
    %149 = vector.extract_strided_slice %144 {offsets = [0, 4], sizes = [3, 1], strides = [1, 1]} : vector<3x8xf32> to vector<3x1xf32>
    %150 = vector.extract_strided_slice %144 {offsets = [0, 5], sizes = [3, 1], strides = [1, 1]} : vector<3x8xf32> to vector<3x1xf32>
    %151 = vector.broadcast %145 : vector<3x1xf32> to vector<3x256xf32>
    %152 = vector.broadcast %115 : vector<1x256xf32> to vector<3x256xf32>
    %153 = arith.mulf %151, %152 : vector<3x256xf32>
    %154 = vector.broadcast %147 : vector<3x1xf32> to vector<3x256xf32>
    %155 = arith.addf %154, %153 : vector<3x256xf32>
    %c1_37 = arith.constant 1 : index
    %c0_38 = arith.constant 0 : index
    %c0_39 = arith.constant 0 : index
    %156 = vector.load %arg6[%c1_37, %c0_38, %c0_39] : memref<2x18x256xf32, #tpu.memory_space<vmem>>, vector<1x3x256xf32>
    %157 = vector.shape_cast %156 : vector<1x3x256xf32> to vector<3x256xf32>
    %158 = vector.shape_cast %155 : vector<3x256xf32> to vector<1x3x256xf32>
    tpu.vector_store %arg6[%c1_37, %c0_38, %c0_39], %158 {strides = array<i32>} : memref<2x18x256xf32, #tpu.memory_space<vmem>>, vector<1x3x256xf32>,
    %159 = vector.broadcast %148 : vector<3x1xf32> to vector<3x256xf32>
    %160 = vector.broadcast %115 : vector<1x256xf32> to vector<3x256xf32>
    %161 = arith.mulf %159, %160 : vector<3x256xf32>
    %162 = vector.broadcast %145 : vector<3x1xf32> to vector<3x256xf32>
    %163 = vector.broadcast %138 : vector<1x256xf32> to vector<3x256xf32>
    %164 = arith.mulf %162, %163 : vector<3x256xf32>
    %165 = arith.addf %161, %164 : vector<3x256xf32>
    %c1_40 = arith.constant 1 : index
    %c3_41 = arith.constant 3 : index
    %c0_42 = arith.constant 0 : index
    %166 = vector.load %arg6[%c1_40, %c3_41, %c0_42] : memref<2x18x256xf32, #tpu.memory_space<vmem>>, vector<1x3x256xf32>
    %167 = vector.shape_cast %166 : vector<1x3x256xf32> to vector<3x256xf32>
    %168 = vector.shape_cast %165 : vector<3x256xf32> to vector<1x3x256xf32>
    tpu.vector_store %arg6[%c1_40, %c3_41, %c0_42], %168 {strides = array<i32>} : memref<2x18x256xf32, #tpu.memory_space<vmem>>, vector<1x3x256xf32>,
    %169 = vector.broadcast %149 : vector<3x1xf32> to vector<3x256xf32>
    %170 = vector.broadcast %115 : vector<1x256xf32> to vector<3x256xf32>
    %171 = arith.mulf %169, %170 : vector<3x256xf32>
    %172 = vector.broadcast %145 : vector<3x1xf32> to vector<3x256xf32>
    %173 = vector.broadcast %140 : vector<1x256xf32> to vector<3x256xf32>
    %174 = arith.mulf %172, %173 : vector<3x256xf32>
    %175 = arith.addf %171, %174 : vector<3x256xf32>
    %c1_43 = arith.constant 1 : index
    %c6_44 = arith.constant 6 : index
    %c0_45 = arith.constant 0 : index
    %176 = vector.load %arg6[%c1_43, %c6_44, %c0_45] : memref<2x18x256xf32, #tpu.memory_space<vmem>>, vector<1x3x256xf32>
    %177 = vector.shape_cast %176 : vector<1x3x256xf32> to vector<3x256xf32>
    %178 = vector.shape_cast %175 : vector<3x256xf32> to vector<1x3x256xf32>
    tpu.vector_store %arg6[%c1_43, %c6_44, %c0_45], %178 {strides = array<i32>} : memref<2x18x256xf32, #tpu.memory_space<vmem>>, vector<1x3x256xf32>,
    %179 = vector.broadcast %150 : vector<3x1xf32> to vector<3x256xf32>
    %180 = vector.broadcast %115 : vector<1x256xf32> to vector<3x256xf32>
    %181 = arith.mulf %179, %180 : vector<3x256xf32>
    %182 = vector.broadcast %145 : vector<3x1xf32> to vector<3x256xf32>
    %183 = vector.broadcast %142 : vector<1x256xf32> to vector<3x256xf32>
    %184 = arith.mulf %182, %183 : vector<3x256xf32>
    %185 = arith.addf %181, %184 : vector<3x256xf32>
    %c1_46 = arith.constant 1 : index
    %c9_47 = arith.constant 9 : index
    %c0_48 = arith.constant 0 : index
    %186 = vector.load %arg6[%c1_46, %c9_47, %c0_48] : memref<2x18x256xf32, #tpu.memory_space<vmem>>, vector<1x3x256xf32>
    %187 = vector.shape_cast %186 : vector<1x3x256xf32> to vector<3x256xf32>
    %188 = vector.shape_cast %185 : vector<3x256xf32> to vector<1x3x256xf32>
    tpu.vector_store %arg6[%c1_46, %c9_47, %c0_48], %188 {strides = array<i32>} : memref<2x18x256xf32, #tpu.memory_space<vmem>>, vector<1x3x256xf32>,
    %189 = vector.broadcast %146 : vector<3x1xf32> to vector<3x256xf32>
    %190 = vector.broadcast %115 : vector<1x256xf32> to vector<3x256xf32>
    %191 = arith.mulf %189, %190 : vector<3x256xf32>
    %c1_49 = arith.constant 1 : index
    %c12_50 = arith.constant 12 : index
    %c0_51 = arith.constant 0 : index
    %192 = vector.load %arg6[%c1_49, %c12_50, %c0_51] : memref<2x18x256xf32, #tpu.memory_space<vmem>>, vector<1x3x256xf32>
    %193 = vector.shape_cast %192 : vector<1x3x256xf32> to vector<3x256xf32>
    %194 = vector.shape_cast %191 : vector<3x256xf32> to vector<1x3x256xf32>
    tpu.vector_store %arg6[%c1_49, %c12_50, %c0_51], %194 {strides = array<i32>} : memref<2x18x256xf32, #tpu.memory_space<vmem>>, vector<1x3x256xf32>,
    %c1_52 = arith.constant 1 : index
    %c15_53 = arith.constant 15 : index
    %c0_54 = arith.constant 0 : index
    %195 = vector.load %arg6[%c1_52, %c15_53, %c0_54] : memref<2x18x256xf32, #tpu.memory_space<vmem>>, vector<1x3x256xf32>
    %196 = vector.shape_cast %195 : vector<1x3x256xf32> to vector<3x256xf32>
    %197 = vector.shape_cast %15 : vector<3x256xf32> to vector<1x3x256xf32>
    tpu.vector_store %arg6[%c1_52, %c15_53, %c0_54], %197 {strides = array<i32>} : memref<2x18x256xf32, #tpu.memory_space<vmem>>, vector<1x3x256xf32>,
    return
  }
  func.func @transform_0(%arg0: i32) -> i32 {
    %c0_i32 = arith.constant 0 : i32
    %c0_i32_0 = arith.constant 0 : i32
    return %c0_i32 : i32
  }
  func.func @transform_1(%arg0: i32) -> (i32, i32, i32) {
    %c0_i32 = arith.constant 0 : i32
    %c0_i32_0 = arith.constant 0 : i32
    %c0_i32_1 = arith.constant 0 : i32
    %c0_i32_2 = arith.constant 0 : i32
    return %c0_i32, %c0_i32_0, %c0_i32_1 : i32, i32, i32
  }
  func.func @transform_2(%arg0: i32) -> (i32, i32) {
    %c0_i32 = arith.constant 0 : i32
    %c0_i32_0 = arith.constant 0 : i32
    %c0_i32_1 = arith.constant 0 : i32
    return %c0_i32, %c0_i32_0 : i32, i32
  }
  func.func @transform_3(%arg0: i32) -> (i32, i32) {
    %c0_i32 = arith.constant 0 : i32
    %c0_i32_0 = arith.constant 0 : i32
    %c0_i32_1 = arith.constant 0 : i32
    return %c0_i32, %c0_i32_0 : i32, i32
  }
  func.func @transform_4(%arg0: i32) -> (i32, i32) {
    %c0_i32 = arith.constant 0 : i32
    %c0_i32_0 = arith.constant 0 : i32
    %c0_i32_1 = arith.constant 0 : i32
    return %c0_i32, %c0_i32_0 : i32, i32
  }
  func.func @transform_5(%arg0: i32) -> (i32, i32, i32) {
    %c0_i32 = arith.constant 0 : i32
    %c0_i32_0 = arith.constant 0 : i32
    %c0_i32_1 = arith.constant 0 : i32
    %c0_i32_2 = arith.constant 0 : i32
    return %c0_i32, %c0_i32_0, %c0_i32_1 : i32, i32, i32
  }
}

</mosaic_0001>

<bundles_post_ra>
// kernel: tpu_custom_call.1
= control target key start
LH: loop header
LB: loop body
LE: loop exit
PB: predicated region body
PF: predicated region fallthrough
CT: control target
= control target key end

     0   :  { %11 = vsyncpa [#allocation4], 0  ;;  %s1649_s0 = inlined_call_operand.<no memory space> [shape: f32[1], index: 0, kind: input, shape index: {}]   ;;  %s1650_s1 = inlined_call_operand.vmem [shape: f32[2,3,8], index: 1, kind: input, shape index: {}]   ;;  %s1651_s2 = inlined_call_operand.hbm [shape: f32[128,256], index: 2, kind: input, shape index: {}]   ;;  %s1652_s3 = inlined_call_operand.hbm [shape: f32[256,256], index: 3, kind: input, shape index: {}]   ;;  %s1653_s4 = inlined_call_operand.hbm [shape: f32[256,256], index: 4, kind: input, shape index: {}]   ;;  %s1654_s5 = inlined_call_operand.vmem [shape: f32[2,18,256], index: 5, kind: output, shape index: {}]  }
   0x1   :  { %12 = vsyncpa [#allocation6], 0  ;;  %s1185_s18 = smov [#allocation5]   ;;  %s1186_s20 = smov [#allocation3]  }
   0x2   :  { %s34_s19 = sshll.u32 %s1185_s18, 4  ;;  %s22_s21 = sshll.u32 %s1186_s20, 4  ;;  %s35_s19 = int_to_ptr.vmem [resolvable:$true] %s34_s19  ;;  %s1227_s21 = int_to_ptr.vmem [resolvable:$true] %s22_s21 }
   0x3   :  { %s1115_s24 = scalar_lea.hbm %s1652_s3, 8192 }
   0x4   :  { %p1116_p0 = scmp.ne.s32.totalorder %s1652_s3, %s1115_s24  ;;  %p1119_p1 = scmp.lt.u32.totalorder %s1115_s24, %s1652_s3 }
   0x6   :  { %p1121_p2 = pnand %p1119_p1, %p1116_p0 }
   0x8   :  { %1124 = shalt.err (!%p1121_p2)
}
   0x9   :  { %s1125_s29 = scalar_lea.vmem %s35_s19, 8192  ;;  %p1130_p4 = scmp.lt.s32.totalorder %s35_s19, %s35_s19 }
   0xa   :  { %p1126_p3 = scmp.ne.s32.totalorder %s35_s19, %s1125_s29  ;;  %p1131_p5 = scmp.lt.s32.totalorder %s1125_s29, %s1125_s29 }
   0xc   :  { %p1132_p6 = por %p1131_p5, %p1130_p4 }
   0xe   :  { %p1133_p7 = pnand %p1132_p6, %p1126_p3 }
  0x10   :  { %1136 = shalt.err (!%p1133_p7)
}
  0x11   :  { %s1187_s30 = smov 256   ;;  %s1188_s6 = smov 16  }
  0x12   :  { %40 = dma.hbm_to_vmem [thread:$0]  %s1652_s3, 8192, %s35_s19, [#allocation6], %s1187_s30, %s1187_s30, %s1188_s6  }
  0x13   :  { %s1137_s11 = scalar_lea.hbm %s1651_s2, 4096 }
  0x14   :  { %p1138_p8 = scmp.ne.s32.totalorder %s1651_s2, %s1137_s11  ;;  %p1141_p9 = scmp.lt.u32.totalorder %s1137_s11, %s1651_s2 }
  0x16   :  { %p1143_p10 = pnand %p1141_p9, %p1138_p8 }
  0x18   :  { %1146 = shalt.err (!%p1143_p10)
}
  0x19   :  { %s1147_s16 = scalar_lea.vmem %s1227_s21, 4096  ;;  %p1152_p12 = scmp.lt.s32.totalorder %s1227_s21, %s1227_s21 }
  0x1a   :  { %p1148_p11 = scmp.ne.s32.totalorder %s1227_s21, %s1147_s16  ;;  %p1153_p13 = scmp.lt.s32.totalorder %s1147_s16, %s1147_s16 }
  0x1c   :  { %p1154_p0 = por %p1153_p13, %p1152_p12 }
  0x1e   :  { %p1155_p1 = pnand %p1154_p0, %p1148_p11 }
  0x20   :  { %1158 = shalt.err (!%p1155_p1)
}
  0x21   :  { %28 = dma.hbm_to_vmem [thread:$0]  %s1651_s2, 4096, %s1227_s21, [#allocation4], %s1187_s30, %s1187_s30, %s1188_s6  }
  0x22   :  { %s1189_s18 = smov [#allocation7]   ;;  %s1159_s23 = scalar_lea.hbm %s1653_s4, 8192 }
  0x23   :  { %s46_s19 = sshll.u32 %s1189_s18, 4  ;;  %p1160_p2 = scmp.ne.s32.totalorder %s1653_s4, %s1159_s23  ;;  %s47_s19 = int_to_ptr.vmem [resolvable:$true] %s46_s19 }
  0x24   :  { %p1163_p3 = scmp.lt.u32.totalorder %s1159_s23, %s1653_s4 }
  0x26   :  { %p1165_p4 = pnand %p1163_p3, %p1160_p2 }
  0x28   :  { %1168 = shalt.err (!%p1165_p4)
}
  0x29   :  { %s1169_s28 = scalar_lea.vmem %s47_s19, 8192  ;;  %p1174_p6 = scmp.lt.s32.totalorder %s47_s19, %s47_s19 }
  0x2a   :  { %p1170_p5 = scmp.ne.s32.totalorder %s47_s19, %s1169_s28  ;;  %p1175_p7 = scmp.lt.s32.totalorder %s1169_s28, %s1169_s28 }
  0x2c   :  { %p1176_p8 = por %p1175_p7, %p1174_p6 }
  0x2e   :  { %p1177_p9 = pnand %p1176_p8, %p1170_p5 }
  0x30   :  { %1180 = shalt.err (!%p1177_p9)
}
  0x31   :  { %52 = dma.hbm_to_vmem [thread:$0]  %s1653_s4, 8192, %s47_s19, [#allocation6], %s1187_s30, %s1187_s30, %s1188_s6  }
  0x32   :  { %1181 = dma.done.wait [#allocation4], 4096  }
  0x33   :  { %1182 = vsyncadd [#allocation4], 4294963200 }
  0x34   :  { %1183 = dma.done.wait [#allocation6], 16384  }
  0x35   :  { %1184 = vsyncadd [#allocation6], 4294950912  ;;  %v1190_v0 = vmov 0.33333334   ;;  %v95_v1 = vld [vmem:[#allocation5 + $0x8] sm:$0xff]  ;;  %v97_v2 = vld [vmem:[#allocation5 + $0x18] sm:$0xff] }
  0x36   :  { %749 = vst [vmem:[%s1654_s5 + $0x10] sm:$0x80] %v1190_v0  ;;  %750 = vst [vmem:[%s1654_s5 + $0x18] sm:$0x80] %v1190_v0  ;;  %v159_v3 = vld [vmem:[#allocation7 + $0x8] sm:$0xff]  ;;  %v948_v4 = vpack.c.bf16 %v97_v2, %v95_v1  ;;  %v161_v5 = vld [vmem:[#allocation7 + $0x18] sm:$0xff] }
  0x37   :  { %751 = vst [vmem:[%s1654_s5 + $0x20] sm:$0x3] %v1190_v0  ;;  %752 = vst [vmem:[%s1654_s5 + $0x28] sm:$0x3] %v1190_v0  ;;  %v94_v6 = vld [vmem:[#allocation5] sm:$0xff]  ;;  %v96_v7 = vld [vmem:[#allocation5 + $0x10] sm:$0xff]  ;;  %v1012_v10 = vpack.c.bf16 %v161_v5, %v159_v3 }
  0x38   :  { %944 = vst [vmem:[%s1654_s5 + $0x40] sm:$0x80] %v1190_v0  ;;  %945 = vst [vmem:[%s1654_s5 + $0x48] sm:$0x80] %v1190_v0  ;;  %v1191_v8 = vmov 4   ;;  %v1192_v9 = vmov 0   ;;  %v950_v11 = vpack.c.bf16 %v96_v7, %v94_v6  ;;  %949 = vmatprep.subr.bf16.mxu1 %v948_v4 }
  0x39   :  { %946 = vst [vmem:[%s1654_s5 + $0x50] sm:$0x3] %v1190_v0  ;;  %947 = vst [vmem:[%s1654_s5 + $0x58] sm:$0x3] %v1190_v0  ;;  %1106 = vset.pattern.permute.xlu1 %v1191_v8  ;;  %1104 = vset.pattern.permute.xlu0 %v1192_v9  ;;  %v158_v12 = vld [vmem:[#allocation7] sm:$0xff]  ;;  %v160_v13 = vld [vmem:[#allocation7 + $0x10] sm:$0xff] }
  0x3a   :  { %v99_v14 = vld [vmem:[#allocation5 + $0x28] sm:$0xff]  ;;  %v1014_v15 = vpack.c.bf16 %v160_v13, %v158_v12  ;;  %v101_v16 = vld [vmem:[#allocation5 + $0x38] sm:$0xff]  ;;  %1013 = vmatprep.subr.bf16.mxu0 %v1012_v10  ;;  %951 = vmatpush1.bf16.msra.mxu1 %v950_v11  ;;  %v98_v21 = vld [vmem:[#allocation5 + $0x20] sm:$0xff]  ;;  %s577_s24 = smul.f32 0.33333334, %s1649_s0 }
  0x3b   :  { %v163_v17 = vld [vmem:[#allocation7 + $0x28] sm:$0xff]  ;;  %v165_v18 = vld [vmem:[#allocation7 + $0x38] sm:$0xff]  ;;  %v952_v19 = vpack.c.bf16 %v101_v16, %v99_v14  ;;  %v100_v22 = vld [vmem:[#allocation5 + $0x30] sm:$0xff]  ;;  %s578_s27 = smul.f32 43.333332, %s1649_s0 }
  0x3c   :  { %v1016_v20 = vpack.c.bf16 %v165_v18, %v163_v17  ;;  %v162_v23 = vld [vmem:[#allocation7 + $0x20] sm:$0xff]  ;;  %1015 = vmatpush1.bf16.msra.mxu0 %v1014_v15  ;;  %v954_v24 = vpack.c.bf16 %v100_v22, %v98_v21  ;;  %v164_v25 = vld [vmem:[#allocation7 + $0x30] sm:$0xff]  ;;  %v103_v26 = vld [vmem:[#allocation5 + $0x48] sm:$0xff]  ;;  %s579_s21 = smul.f32 666.6667, %s1649_s0 }
  0x3d   :  { %v105_v27 = vld [vmem:[#allocation5 + $0x58] sm:$0xff]  ;;  %953 = vmatprep.subr.bf16.mxu1 %v952_v19  ;;  %v1018_v28 = vpack.c.bf16 %v164_v25, %v162_v23  ;;  %v167_v30 = vld [vmem:[#allocation7 + $0x48] sm:$0xff]  ;;  %v102_v32 = vld [vmem:[#allocation5 + $0x40] sm:$0xff] }
  0x3e   :  { %1017 = vmatprep.subr.bf16.mxu0 %v1016_v20  ;;  %v956_v29 = vpack.c.bf16 %v105_v27, %v103_v26  ;;  %v169_v31 = vld [vmem:[#allocation7 + $0x58] sm:$0xff]  ;;  %v104_v34 = vld [vmem:[#allocation5 + $0x50] sm:$0xff]  ;;  %v166_v35 = vld [vmem:[#allocation7 + $0x40] sm:$0xff]  ;;  %955 = vmatpush1.bf16.msra.mxu1 %v954_v24 }
  0x3f   :  { %v1020_v33 = vpack.c.bf16 %v169_v31, %v167_v30  ;;  %v168_v36 = vld [vmem:[#allocation7 + $0x50] sm:$0xff]  ;;  %v958_v37 = vpack.c.bf16 %v104_v34, %v102_v32  ;;  %v107_v38 = vld [vmem:[#allocation5 + $0x68] sm:$0xff]  ;;  %v109_v39 = vld [vmem:[#allocation5 + $0x78] sm:$0xff] }
  0x40   :  { %v171_v40 = vld [vmem:[#allocation7 + $0x68] sm:$0xff]  ;;  %1019 = vmatpush1.bf16.msra.mxu0 %v1018_v28  ;;  %957 = vmatprep.subr.bf16.mxu1 %v956_v29  ;;  %v1022_v41 = vpack.c.bf16 %v168_v36, %v166_v35  ;;  %v960_v42 = vpack.c.bf16 %v109_v39, %v107_v38  ;;  %v173_v43 = vld [vmem:[#allocation7 + $0x78] sm:$0xff]  ;;  %v106_v44 = vld [vmem:[#allocation5 + $0x60] sm:$0xff] }
  0x41   :  { %v108_v45 = vld [vmem:[#allocation5 + $0x70] sm:$0xff]  ;;  %1021 = vmatprep.subr.bf16.mxu0 %v1020_v33  ;;  %v1024_v46 = vpack.c.bf16 %v173_v43, %v171_v40  ;;  %v170_v47 = vld [vmem:[#allocation7 + $0x60] sm:$0xff]  ;;  %v111_v49 = vld [vmem:[#allocation5 + $0x88] sm:$0xff] }
  0x42   :  { %v172_v48 = vld [vmem:[#allocation7 + $0x70] sm:$0xff]  ;;  %v113_v50 = vld [vmem:[#allocation5 + $0x98] sm:$0xff]  ;;  %v175_v51 = vld [vmem:[#allocation7 + $0x88] sm:$0xff]  ;;  %959 = vmatpush1.bf16.msra.mxu1 %v958_v37  ;;  %v962_v53 = vpack.c.bf16 %v108_v45, %v106_v44 }
  0x43   :  { %v177_v52 = vld [vmem:[#allocation7 + $0x98] sm:$0xff]  ;;  %961 = vmatprep.subr.bf16.mxu1 %v960_v42  ;;  %v1026_v54 = vpack.c.bf16 %v172_v48, %v170_v47  ;;  %v964_v55 = vpack.c.bf16 %v113_v50, %v111_v49  ;;  %v110_v56 = vld [vmem:[#allocation5 + $0x80] sm:$0xff]  ;;  %v112_v57 = vld [vmem:[#allocation5 + $0x90] sm:$0xff] }
  0x44   :  { %1023 = vmatpush1.bf16.msra.mxu0 %v1022_v41  ;;  %v174_v58 = vld [vmem:[#allocation7 + $0x80] sm:$0xff]  ;;  %v1028_v59 = vpack.c.bf16 %v177_v52, %v175_v51  ;;  %v176_v60 = vld [vmem:[#allocation7 + $0x90] sm:$0xff]  ;;  %v115_v61 = vld [vmem:[#allocation5 + $0xa8] sm:$0xff]  ;;  %v966_v1 = vpack.c.bf16 %v112_v57, %v110_v56 }
  0x45   :  { %1025 = vmatprep.subr.bf16.mxu0 %v1024_v46  ;;  %v117_v62 = vld [vmem:[#allocation5 + $0xb8] sm:$0xff]  ;;  %v179_v63 = vld [vmem:[#allocation7 + $0xa8] sm:$0xff]  ;;  %v1030_v2 = vpack.c.bf16 %v176_v60, %v174_v58  ;;  %v114_v4 = vld [vmem:[#allocation5 + $0xa0] sm:$0xff] }
  0x46   :  { %v181_v0 = vld [vmem:[#allocation7 + $0xb8] sm:$0xff]  ;;  %963 = vmatpush1.bf16.msra.mxu1 %v962_v53  ;;  %v968_v3 = vpack.c.bf16 %v117_v62, %v115_v61  ;;  %v116_v5 = vld [vmem:[#allocation5 + $0xb0] sm:$0xff]  ;;  %v178_v6 = vld [vmem:[#allocation7 + $0xa0] sm:$0xff] }
  0x47   :  { %965 = vmatprep.subr.bf16.mxu1 %v964_v55  ;;  %v1032_v7 = vpack.c.bf16 %v181_v0, %v179_v63  ;;  %v180_v10 = vld [vmem:[#allocation7 + $0xb0] sm:$0xff]  ;;  %v119_v11 = vld [vmem:[#allocation5 + $0xc8] sm:$0xff]  ;;  %v121_v12 = vld [vmem:[#allocation5 + $0xd8] sm:$0xff]  ;;  %v970_v15 = vpack.c.bf16 %v116_v5, %v114_v4 }
  0x48   :  { %1027 = vmatpush1.bf16.msra.mxu0 %v1026_v54  ;;  %v183_v13 = vld [vmem:[#allocation7 + $0xc8] sm:$0xff]  ;;  %v185_v14 = vld [vmem:[#allocation7 + $0xd8] sm:$0xff]  ;;  %v1034_v16 = vpack.c.bf16 %v180_v10, %v178_v6  ;;  %v972_v17 = vpack.c.bf16 %v121_v12, %v119_v11  ;;  %v118_v18 = vld [vmem:[#allocation5 + $0xc0] sm:$0xff] }
  0x49   :  { %1029 = vmatprep.subr.bf16.mxu0 %v1028_v59  ;;  %v120_v19 = vld [vmem:[#allocation5 + $0xd0] sm:$0xff]  ;;  %v182_v20 = vld [vmem:[#allocation7 + $0xc0] sm:$0xff]  ;;  %v1036_v21 = vpack.c.bf16 %v185_v14, %v183_v13  ;;  %v123_v23 = vld [vmem:[#allocation5 + $0xe8] sm:$0xff] }
  0x4a   :  { %967 = vmatpush1.bf16.msra.mxu1 %v966_v1  ;;  %v184_v22 = vld [vmem:[#allocation7 + $0xd0] sm:$0xff]  ;;  %v125_v24 = vld [vmem:[#allocation5 + $0xf8] sm:$0xff]  ;;  %v187_v25 = vld [vmem:[#allocation7 + $0xe8] sm:$0xff]  ;;  %v974_v27 = vpack.c.bf16 %v120_v19, %v118_v18 }
  0x4b   :  { %969 = vmatprep.subr.bf16.mxu1 %v968_v3  ;;  %v189_v26 = vld [vmem:[#allocation7 + $0xf8] sm:$0xff]  ;;  %v1038_v28 = vpack.c.bf16 %v184_v22, %v182_v20  ;;  %v976_v29 = vpack.c.bf16 %v125_v24, %v123_v23  ;;  %v122_v30 = vld [vmem:[#allocation5 + $0xe0] sm:$0xff]  ;;  %v124_v31 = vld [vmem:[#allocation5 + $0xf0] sm:$0xff] }
  0x4c   :  { %1031 = vmatpush1.bf16.msra.mxu0 %v1030_v2  ;;  %v186_v32 = vld [vmem:[#allocation7 + $0xe0] sm:$0xff]  ;;  %v1040_v33 = vpack.c.bf16 %v189_v26, %v187_v25  ;;  %v188_v34 = vld [vmem:[#allocation7 + $0xf0] sm:$0xff]  ;;  %v127_v35 = vld [vmem:[#allocation5 + $0x108] sm:$0xff]  ;;  %v978_v39 = vpack.c.bf16 %v124_v31, %v122_v30 }
  0x4d   :  { %1033 = vmatprep.subr.bf16.mxu0 %v1032_v7  ;;  %v129_v36 = vld [vmem:[#allocation5 + $0x118] sm:$0xff]  ;;  %v191_v37 = vld [vmem:[#allocation7 + $0x108] sm:$0xff]  ;;  %v1042_v40 = vpack.c.bf16 %v188_v34, %v186_v32  ;;  %v126_v42 = vld [vmem:[#allocation5 + $0x100] sm:$0xff] }
  0x4e   :  { %971 = vmatpush1.bf16.msra.mxu1 %v970_v15  ;;  %v193_v38 = vld [vmem:[#allocation7 + $0x118] sm:$0xff]  ;;  %v980_v41 = vpack.c.bf16 %v129_v36, %v127_v35  ;;  %v128_v43 = vld [vmem:[#allocation5 + $0x110] sm:$0xff]  ;;  %v190_v44 = vld [vmem:[#allocation7 + $0x100] sm:$0xff] }
  0x4f   :  { %973 = vmatprep.subr.bf16.mxu1 %v972_v17  ;;  %v1044_v45 = vpack.c.bf16 %v193_v38, %v191_v37  ;;  %v192_v46 = vld [vmem:[#allocation7 + $0x110] sm:$0xff]  ;;  %v131_v47 = vld [vmem:[#allocation5 + $0x128] sm:$0xff]  ;;  %v133_v48 = vld [vmem:[#allocation5 + $0x138] sm:$0xff]  ;;  %v982_v51 = vpack.c.bf16 %v128_v43, %v126_v42 }
  0x50   :  { %1035 = vmatpush1.bf16.msra.mxu0 %v1034_v16  ;;  %v195_v49 = vld [vmem:[#allocation7 + $0x128] sm:$0xff]  ;;  %v197_v50 = vld [vmem:[#allocation7 + $0x138] sm:$0xff]  ;;  %v1046_v52 = vpack.c.bf16 %v192_v46, %v190_v44  ;;  %v984_v53 = vpack.c.bf16 %v133_v48, %v131_v47  ;;  %v130_v54 = vld [vmem:[#allocation5 + $0x120] sm:$0xff] }
  0x51   :  { %1037 = vmatprep.subr.bf16.mxu0 %v1036_v21  ;;  %v132_v55 = vld [vmem:[#allocation5 + $0x130] sm:$0xff]  ;;  %v194_v56 = vld [vmem:[#allocation7 + $0x120] sm:$0xff]  ;;  %v1048_v57 = vpack.c.bf16 %v197_v50, %v195_v49  ;;  %v135_v59 = vld [vmem:[#allocation5 + $0x148] sm:$0xff] }
  0x52   :  { %975 = vmatpush1.bf16.msra.mxu1 %v974_v27  ;;  %v196_v58 = vld [vmem:[#allocation7 + $0x130] sm:$0xff]  ;;  %v137_v60 = vld [vmem:[#allocation5 + $0x158] sm:$0xff]  ;;  %v199_v61 = vld [vmem:[#allocation7 + $0x148] sm:$0xff]  ;;  %v986_v63 = vpack.c.bf16 %v132_v55, %v130_v54 }
  0x53   :  { %977 = vmatprep.subr.bf16.mxu1 %v976_v29  ;;  %v201_v62 = vld [vmem:[#allocation7 + $0x158] sm:$0xff]  ;;  %v1050_v0 = vpack.c.bf16 %v196_v58, %v194_v56  ;;  %v988_v1 = vpack.c.bf16 %v137_v60, %v135_v59  ;;  %v134_v2 = vld [vmem:[#allocation5 + $0x140] sm:$0xff]  ;;  %v136_v3 = vld [vmem:[#allocation5 + $0x150] sm:$0xff] }
  0x54   :  { %1039 = vmatpush1.bf16.msra.mxu0 %v1038_v28  ;;  %v198_v4 = vld [vmem:[#allocation7 + $0x140] sm:$0xff]  ;;  %v1052_v5 = vpack.c.bf16 %v201_v62, %v199_v61  ;;  %v200_v6 = vld [vmem:[#allocation7 + $0x150] sm:$0xff]  ;;  %v139_v7 = vld [vmem:[#allocation5 + $0x168] sm:$0xff]  ;;  %v990_v13 = vpack.c.bf16 %v136_v3, %v134_v2 }
  0x55   :  { %1041 = vmatprep.subr.bf16.mxu0 %v1040_v33  ;;  %v141_v10 = vld [vmem:[#allocation5 + $0x178] sm:$0xff]  ;;  %v203_v11 = vld [vmem:[#allocation7 + $0x168] sm:$0xff]  ;;  %v138_v14 = vld [vmem:[#allocation5 + $0x160] sm:$0xff]  ;;  %v1054_v15 = vpack.c.bf16 %v200_v6, %v198_v4 }
  0x56   :  { %979 = vmatpush1.bf16.msra.mxu1 %v978_v39  ;;  %v205_v12 = vld [vmem:[#allocation7 + $0x178] sm:$0xff]  ;;  %v992_v16 = vpack.c.bf16 %v141_v10, %v139_v7  ;;  %v140_v17 = vld [vmem:[#allocation5 + $0x170] sm:$0xff]  ;;  %v202_v18 = vld [vmem:[#allocation7 + $0x160] sm:$0xff]  ;;  %v1193_v7 = vmov 5   ;;  %v1194_v10 = vmov 3  }
  0x57   :  { %981 = vmatprep.subr.bf16.mxu1 %v980_v41  ;;  %v204_v19 = vld [vmem:[#allocation7 + $0x170] sm:$0xff]  ;;  %v1056_v20 = vpack.c.bf16 %v205_v12, %v203_v11  ;;  %v143_v21 = vld [vmem:[#allocation5 + $0x188] sm:$0xff]  ;;  %v145_v22 = vld [vmem:[#allocation5 + $0x198] sm:$0xff]  ;;  %v994_v26 = vpack.c.bf16 %v140_v17, %v138_v14 }
  0x58   :  { %1043 = vmatpush1.bf16.msra.mxu0 %v1042_v40  ;;  %v63_v23 = vld [vmem:[#allocation3 + $0x8] sm:$0xff]  ;;  %v209_v25 = vld [vmem:[#allocation7 + $0x198] sm:$0xff]  ;;  %v1058_v27 = vpack.c.bf16 %v204_v19, %v202_v18  ;;  %v996_v28 = vpack.c.bf16 %v145_v22, %v143_v21  ;;  %v142_v29 = vld [vmem:[#allocation5 + $0x180] sm:$0xff]  ;;  %v1195_v19 = vmov 1  }
  0x59   :  { %1045 = vmatprep.subr.bf16.mxu0 %v1044_v45  ;;  %v207_v24 = vld [vmem:[#allocation7 + $0x188] sm:$0xff]  ;;  %286 = vmatprep.mubr.f32.mxu1 %v63_v23  ;;  %v144_v30 = vld [vmem:[#allocation5 + $0x190] sm:$0xff]  ;;  %v206_v31 = vld [vmem:[#allocation7 + $0x180] sm:$0xff] }
  0x5a   :  { %983 = vmatpush1.bf16.msra.mxu1 %v982_v51  ;;  %447 = vmatprep.mubr.f32.mxu0 %v63_v23  ;;  %v1060_v32 = vpack.c.bf16 %v209_v25, %v207_v24  ;;  %v208_v33 = vld [vmem:[#allocation7 + $0x190] sm:$0xff]  ;;  %v147_v34 = vld [vmem:[#allocation5 + $0x1a8] sm:$0xff]  ;;  %v149_v35 = vld [vmem:[#allocation5 + $0x1b8] sm:$0xff]  ;;  %v998_v38 = vpack.c.bf16 %v144_v30, %v142_v29 }
  0x5b   :  { %985 = vmatprep.subr.bf16.mxu1 %v984_v53  ;;  %v211_v36 = vld [vmem:[#allocation7 + $0x1a8] sm:$0xff]  ;;  %v213_v37 = vld [vmem:[#allocation7 + $0x1b8] sm:$0xff]  ;;  %v1062_v39 = vpack.c.bf16 %v208_v33, %v206_v31  ;;  %v1000_v40 = vpack.c.bf16 %v149_v35, %v147_v34  ;;  %v146_v41 = vld [vmem:[#allocation5 + $0x1a0] sm:$0xff] }
  0x5c   :  { %1047 = vmatpush1.bf16.msra.mxu0 %v1046_v52  ;;  %v148_v42 = vld [vmem:[#allocation5 + $0x1b0] sm:$0xff]  ;;  %v210_v43 = vld [vmem:[#allocation7 + $0x1a0] sm:$0xff]  ;;  %v1064_v44 = vpack.c.bf16 %v213_v37, %v211_v36  ;;  %v151_v46 = vld [vmem:[#allocation5 + $0x1c8] sm:$0xff] }
  0x5d   :  { %1049 = vmatprep.subr.bf16.mxu0 %v1048_v57  ;;  %v212_v45 = vld [vmem:[#allocation7 + $0x1b0] sm:$0xff]  ;;  %v153_v47 = vld [vmem:[#allocation5 + $0x1d8] sm:$0xff]  ;;  %v215_v48 = vld [vmem:[#allocation7 + $0x1c8] sm:$0xff]  ;;  %v1002_v50 = vpack.c.bf16 %v148_v42, %v146_v41 }
  0x5e   :  { %987 = vmatpush1.bf16.msra.mxu1 %v986_v63  ;;  %v217_v49 = vld [vmem:[#allocation7 + $0x1d8] sm:$0xff]  ;;  %v150_v51 = vld [vmem:[#allocation5 + $0x1c0] sm:$0xff]  ;;  %v1066_v52 = vpack.c.bf16 %v212_v45, %v210_v43  ;;  %v1004_v53 = vpack.c.bf16 %v153_v47, %v151_v46  ;;  %v152_v54 = vld [vmem:[#allocation5 + $0x1d0] sm:$0xff] }
  0x5f   :  { %989 = vmatprep.subr.bf16.mxu1 %v988_v1  ;;  %v214_v55 = vld [vmem:[#allocation7 + $0x1c0] sm:$0xff]  ;;  %v1068_v57 = vpack.c.bf16 %v217_v49, %v215_v48  ;;  %v216_v58 = vld [vmem:[#allocation7 + $0x1d0] sm:$0xff]  ;;  %v155_v59 = vld [vmem:[#allocation5 + $0x1e8] sm:$0xff]  ;;  %v1006_v63 = vpack.c.bf16 %v152_v54, %v150_v51 }
  0x60   :  { %1051 = vmatpush1.bf16.msra.mxu0 %v1050_v0  ;;  %v1308_v56 = vld [vmem:[%s1650_s1] sm:$0x7]  ;;  %v157_v60 = vld [vmem:[#allocation5 + $0x1f8] sm:$0xff]  ;;  %v219_v61 = vld [vmem:[#allocation7 + $0x1e8] sm:$0xff]  ;;  %v1070_v0 = vpack.c.bf16 %v216_v58, %v214_v55 }
  0x61   :  { %1053 = vmatprep.subr.bf16.mxu0 %v1052_v5  ;;  %698 = vperm.xlu1 %1106, %v1308_v56   ;;  %v221_v62 = vld [vmem:[#allocation7 + $0x1f8] sm:$0xff]  ;;  %v1008_v1 = vpack.c.bf16 %v157_v60, %v155_v59  ;;  %v154_v2 = vld [vmem:[#allocation5 + $0x1e0] sm:$0xff]  ;;  %v156_v3 = vld [vmem:[#allocation5 + $0x1f0] sm:$0xff] }
  0x62   :  { %991 = vmatpush1.bf16.msra.mxu1 %v990_v13  ;;  %666 = vperm.xlu0 %1104, %v1308_v56   ;;  %v1072_v4 = vpack.c.bf16 %v221_v62, %v219_v61  ;;  %v218_v5 = vld [vmem:[#allocation7 + $0x1e0] sm:$0xff]  ;;  %v220_v6 = vld [vmem:[#allocation7 + $0x1f0] sm:$0xff]  ;;  %v1010_v11 = vpack.c.bf16 %v156_v3, %v154_v2  ;;  %v67_v17 = vld [vmem:[#allocation3 + $0x28] sm:$0xff] }
  0x63   :  { %993 = vmatprep.subr.bf16.mxu1 %v992_v16  ;;  %v1074_v12 = vpack.c.bf16 %v220_v6, %v218_v5  ;;  %v931_v13 = vld [vmem:[%s1650_s1 + $0x4] sm:$0x7]  ;;  %v64_v16 = vld [vmem:[#allocation3 + $0x10] sm:$0xff]  ;;  %v69_v18 = vld [vmem:[#allocation3 + $0x38] sm:$0xff] }
  0x64   :  { %1055 = vmatpush1.bf16.msra.mxu0 %v1054_v15  ;;  %v62_v14 = vld [vmem:[#allocation3] sm:$0xff]  ;;  %v65_v15 = vld [vmem:[#allocation3 + $0x18] sm:$0xff]  ;;  %v71_v21 = vld [vmem:[#allocation3 + $0x48] sm:$0xff] }
  0x65   :  { %1057 = vmatprep.subr.bf16.mxu0 %v1056_v20  ;;  %1107 = vset.pattern.permute.xlu1 %v1193_v7  ;;  %v68_v20 = vld [vmem:[#allocation3 + $0x30] sm:$0xff]  ;;  %v70_v22 = vld [vmem:[#allocation3 + $0x40] sm:$0xff]  ;;  %v73_v23 = vld [vmem:[#allocation3 + $0x58] sm:$0xff] }
  0x66   :  { %995 = vmatpush1.bf16.msra.mxu1 %v994_v26  ;;  %718 = vperm.xlu1 %1107, %v1308_v56   ;;  %v72_v24 = vld [vmem:[#allocation3 + $0x50] sm:$0xff]  ;;  %v75_v25 = vld [vmem:[#allocation3 + $0x68] sm:$0xff]  ;;  %v74_v26 = vld [vmem:[#allocation3 + $0x60] sm:$0xff] }
  0x67   :  { %997 = vmatprep.subr.bf16.mxu1 %v996_v28  ;;  %1105 = vset.pattern.permute.xlu0 %v1194_v10  ;;  %v76_v28 = vld [vmem:[#allocation3 + $0x70] sm:$0xff]  ;;  %v79_v29 = vld [vmem:[#allocation3 + $0x88] sm:$0xff]  ;;  %v78_v30 = vld [vmem:[#allocation3 + $0x80] sm:$0xff] }
  0x68   :  { %1059 = vmatpush1.bf16.msra.mxu0 %v1058_v27  ;;  %680 = vperm.xlu0 %1105, %v1308_v56   ;;  %v77_v27 = vld [vmem:[#allocation3 + $0x78] sm:$0xff]  ;;  %v83_v33 = vld [vmem:[#allocation3 + $0xa8] sm:$0xff]  ;;  %v82_v34 = vld [vmem:[#allocation3 + $0xa0] sm:$0xff] }
  0x69   :  { %1061 = vmatprep.subr.bf16.mxu0 %v1060_v32  ;;  %v81_v31 = vld [vmem:[#allocation3 + $0x98] sm:$0xff]  ;;  %v80_v32 = vld [vmem:[#allocation3 + $0x90] sm:$0xff]  ;;  %v87_v37 = vld [vmem:[#allocation3 + $0xc8] sm:$0xff] }
  0x6a   :  { %999 = vmatpush1.bf16.msra.mxu1 %v998_v38  ;;  %1108 = vset.pattern.permute.xlu1 %v1192_v9  ;;  %v66_v9 = vld [vmem:[#allocation3 + $0x20] sm:$0xff]  ;;  %v85_v35 = vld [vmem:[#allocation3 + $0xb8] sm:$0xff]  ;;  %v84_v36 = vld [vmem:[#allocation3 + $0xb0] sm:$0xff] }
  0x6b   :  { %1001 = vmatprep.subr.bf16.mxu1 %v1000_v40  ;;  %837 = vperm.xlu1 %1108, %v931_v13   ;;  %v86_v38 = vld [vmem:[#allocation3 + $0xc0] sm:$0xff]  ;;  %v88_v40 = vld [vmem:[#allocation3 + $0xd0] sm:$0xff]  ;;  %v91_v41 = vld [vmem:[#allocation3 + $0xe8] sm:$0xff] }
  0x6c   :  { %1063 = vmatpush1.bf16.msra.mxu0 %v1062_v39  ;;  %852 = vperm.xlu0 %1105, %v931_v13   ;;  %v89_v39 = vld [vmem:[#allocation3 + $0xd8] sm:$0xff]  ;;  %v90_v42 = vld [vmem:[#allocation3 + $0xe0] sm:$0xff] }
  0x6d   :  { %1065 = vmatprep.subr.bf16.mxu0 %v1064_v44  ;;  %v93_v43 = vld [vmem:[#allocation3 + $0xf8] sm:$0xff]  ;;  %v92_v44 = vld [vmem:[#allocation3 + $0xf0] sm:$0xff] }
  0x6e   :  { %1003 = vmatpush1.bf16.msra.mxu1 %v1002_v50 }
  0x6f   :  { %1005 = vmatprep.subr.bf16.mxu1 %v1004_v53  ;;  %1109 = vset.pattern.permute.xlu1 %v1191_v8  ;;  %v1196_v8 = vmov 2  }
  0x70   :  { %1067 = vmatpush1.bf16.msra.mxu0 %v1066_v52  ;;  %870 = vperm.xlu1 %1109, %v931_v13  }
  0x71   :  { %1069 = vmatprep.subr.bf16.mxu0 %v1068_v57  ;;  %1110 = vset.pattern.permute.xlu0 %v1193_v7 }
  0x72   :  { %1007 = vmatpush1.bf16.msra.mxu1 %v1006_v63  ;;  %890 = vperm.xlu0 %1110, %v931_v13  }
  0x73   :  { %1009 = vmatprep.subr.bf16.mxu1 %v1008_v1 }
  0x74   :  { %1071 = vmatpush1.bf16.msra.mxu0 %v1070_v0  ;;  %1111 = vset.pattern.permute.xlu1 %v1195_v19 }
  0x75   :  { %1073 = vmatprep.subr.bf16.mxu0 %v1072_v4  ;;  %736 = vperm.xlu1 %1111, %v1308_v56  }
  0x76   :  { %1011 = vmatpush1.bf16.msra.mxu1 %v1010_v11  ;;  %1112 = vset.pattern.permute.xlu0 %v1196_v8 }
  0x77   :  { %672 = vperm.xlu0 %1112, %v1308_v56  }
  0x78   :  { %1075 = vmatpush1.bf16.msra.mxu0 %v1074_v12 }
  0x79   :  { %287 = vmatmul.mubr.f32.vlgmr.msra.gmra.mrb[0].mxu1 %v62_v14  ;;  %908 = vperm.xlu1 %1111, %v931_v13  }
  0x7a   :  { %292 = vmatprep.mubr.f32.mxu1 %v65_v15 }
  0x7b   :  { %448 = vmatmul.mubr.f32.vlgmr.msra.gmra.mrb[0].mxu0 %v62_v14  ;;  %1114 = vset.pattern.permute.xlu0 %v1195_v19 }
  0x7c   :  { %453 = vmatprep.mubr.f32.mxu0 %v65_v15 }
  0x7d   :  { %293 = vmatmul.mubr.f32.gmra.mrb[2].mxu1 %v64_v16  ;;  %1113 = vset.pattern.permute.xlu1 %v1196_v8 }
  0x7e   :  { %298 = vmatprep.mubr.f32.mxu1 %v67_v17  ;;  %843 = vperm.xlu1 %1113, %v931_v13  }
  0x7f   :  { %454 = vmatmul.mubr.f32.gmra.mrb[2].mxu0 %v64_v16 }
  0x80   :  { %459 = vmatprep.mubr.f32.mxu0 %v67_v17 }
  0x81   :  { %299 = vmatmul.mubr.f32.gmra.mrb[4].mxu1 %v66_v9 }
  0x82   :  { %304 = vmatprep.mubr.f32.mxu1 %v69_v18 }
  0x83   :  { %460 = vmatmul.mubr.f32.gmra.mrb[4].mxu0 %v66_v9 }
  0x84   :  { %465 = vmatprep.mubr.f32.mxu0 %v69_v18 }
  0x85   :  { %305 = vmatmul.mubr.f32.gmra.mrb[6].mxu1 %v68_v20 }
  0x86   :  { %310 = vmatprep.mubr.f32.mxu1 %v71_v21 }
  0x87   :  { %466 = vmatmul.mubr.f32.gmra.mrb[6].mxu0 %v68_v20 }
  0x88   :  { %471 = vmatprep.mubr.f32.mxu0 %v71_v21 }
  0x89   :  { %311 = vmatmul.mubr.f32.gmra.mrb[8].mxu1 %v70_v22 }
  0x8a   :  { %316 = vmatprep.mubr.f32.mxu1 %v73_v23 }
  0x8b   :  { %472 = vmatmul.mubr.f32.gmra.mrb[8].mxu0 %v70_v22 }
  0x8c   :  { %477 = vmatprep.mubr.f32.mxu0 %v73_v23 }
  0x8d   :  { %317 = vmatmul.mubr.f32.gmra.mrb[10].mxu1 %v72_v24 }
  0x8e   :  { %322 = vmatprep.mubr.f32.mxu1 %v75_v25 }
  0x8f   :  { %478 = vmatmul.mubr.f32.gmra.mrb[10].mxu0 %v72_v24 }
  0x90   :  { %483 = vmatprep.mubr.f32.mxu0 %v75_v25 }
  0x91   :  { %323 = vmatmul.mubr.f32.gmra.mrb[12].mxu1 %v74_v26 }
  0x92   :  { %328 = vmatprep.mubr.f32.mxu1 %v77_v27 }
  0x93   :  { %484 = vmatmul.mubr.f32.gmra.mrb[12].mxu0 %v74_v26 }
  0x94   :  { %489 = vmatprep.mubr.f32.mxu0 %v77_v27 }
  0x95   :  { %329 = vmatmul.mubr.f32.gmra.mrb[14].mxu1 %v76_v28 }
  0x96   :  { %334 = vmatprep.mubr.f32.mxu1 %v79_v29 }
  0x97   :  { %490 = vmatmul.mubr.f32.gmra.mrb[14].mxu0 %v76_v28 }
  0x98   :  { %495 = vmatprep.mubr.f32.mxu0 %v79_v29 }
  0x99   :  { %335 = vmatmul.mubr.f32.gmra.mrb[16].mxu1 %v78_v30 }
  0x9a   :  { %340 = vmatprep.mubr.f32.mxu1 %v81_v31 }
  0x9b   :  { %496 = vmatmul.mubr.f32.gmra.mrb[16].mxu0 %v78_v30 }
  0x9c   :  { %501 = vmatprep.mubr.f32.mxu0 %v81_v31 }
  0x9d   :  { %341 = vmatmul.mubr.f32.gmra.mrb[18].mxu1 %v80_v32 }
  0x9e   :  { %346 = vmatprep.mubr.f32.mxu1 %v83_v33 }
  0x9f   :  { %502 = vmatmul.mubr.f32.gmra.mrb[18].mxu0 %v80_v32 }
  0xa0   :  { %507 = vmatprep.mubr.f32.mxu0 %v83_v33 }
  0xa1   :  { %347 = vmatmul.mubr.f32.gmra.mrb[20].mxu1 %v82_v34 }
  0xa2   :  { %352 = vmatprep.mubr.f32.mxu1 %v85_v35 }
  0xa3   :  { %508 = vmatmul.mubr.f32.gmra.mrb[20].mxu0 %v82_v34 }
  0xa4   :  { %513 = vmatprep.mubr.f32.mxu0 %v85_v35  ;;  %v1394_v35 = vstv %s577_s24 }
  0xa5   :  { %353 = vmatmul.mubr.f32.gmra.mrb[22].mxu1 %v84_v36 }
  0xa6   :  { %358 = vmatprep.mubr.f32.mxu1 %v87_v37 }
  0xa7   :  { %514 = vmatmul.mubr.f32.gmra.mrb[22].mxu0 %v84_v36 }
  0xa8   :  { %519 = vmatprep.mubr.f32.mxu0 %v87_v37 }
  0xa9   :  { %359 = vmatmul.mubr.f32.gmra.mrb[24].mxu1 %v86_v38 }
  0xaa   :  { %364 = vmatprep.mubr.f32.mxu1 %v89_v39 }
  0xab   :  { %520 = vmatmul.mubr.f32.gmra.mrb[24].mxu0 %v86_v38 }
  0xac   :  { %525 = vmatprep.mubr.f32.mxu0 %v89_v39 }
  0xad   :  { %365 = vmatmul.mubr.f32.gmra.mrb[26].mxu1 %v88_v40 }
  0xae   :  { %370 = vmatprep.mubr.f32.mxu1 %v91_v41 }
  0xaf   :  { %526 = vmatmul.mubr.f32.gmra.mrb[26].mxu0 %v88_v40  ;;  %v1398_v40 = vstv %s578_s27 }
  0xb0   :  { %531 = vmatprep.mubr.f32.mxu0 %v91_v41 }
  0xb1   :  { %371 = vmatmul.mubr.f32.gmra.mrb[28].mxu1 %v90_v42 }
  0xb2   :  { %376 = vmatprep.mubr.f32.mxu1 %v93_v43 }
  0xb3   :  { %532 = vmatmul.mubr.f32.gmra.mrb[28].mxu0 %v90_v42 }
  0xb4   :  { %537 = vmatprep.mubr.f32.mxu0 %v93_v43 }
  0xb5   :  { %377 = vmatmul.mubr.f32.gmra.mrb[30].mxu1 %v92_v44 }
  0xb7   :  { %538 = vmatmul.mubr.f32.gmra.mrb[30].mxu0 %v92_v44 }
  0xe0   :  { %v1392_v30 = vpop.permute.xlu1 %698 }
 0x14c   :  { %v288_v45 = vpop.f32.mrb[0].mxu1 }
 0x14d   :  { %v290_v47 = vpop.f32.mrb[1].mxu1 }
 0x14e   :  { %v449_v46 = vpop.f32.mrb[0].mxu0 }
 0x14f   :  { %v451_v48 = vpop.f32.mrb[1].mxu0 }
 0x150   :  { %v294_v49 = vpop.f32.mrb[2].mxu1 }
 0x151   :  { %v296_v51 = vpop.f32.mrb[3].mxu1 }
 0x152   :  { %v455_v50 = vpop.f32.mrb[2].mxu0 }
 0x153   :  { %v457_v52 = vpop.f32.mrb[3].mxu0 }
 0x154   :  { %v1321_v53 = vpop.f32.mrb[4].mxu1 }
 0x155   :  { %v1323_v55 = vpop.f32.mrb[5].mxu1 }
 0x156   :  { %v461_v54 = vpop.f32.mrb[4].mxu0 }
 0x157   :  { %v1325_v56 = vpop.f32.mrb[5].mxu0 }
 0x158   :  { %v1327_v57 = vpop.f32.mrb[6].mxu1 }
 0x159   :  { %v1331_v59 = vpop.f32.mrb[7].mxu1 }
 0x15a   :  { %v1329_v58 = vpop.f32.mrb[6].mxu0 }
 0x15b   :  { %v1333_v60 = vpop.f32.mrb[7].mxu0 }
 0x15c   :  { %v1335_v61 = vpop.f32.mrb[8].mxu1 }
 0x15d   :  { %v1339_v63 = vpop.f32.mrb[9].mxu1 }
 0x15e   :  { %v1337_v62 = vpop.f32.mrb[8].mxu0 }
 0x15f   :  { %v1341_v0 = vpop.f32.mrb[9].mxu0 }
 0x160   :  { %v1343_v1 = vpop.f32.mrb[10].mxu1 }
 0x161   :  { %v1347_v3 = vpop.f32.mrb[11].mxu1 }
 0x162   :  { %v1345_v2 = vpop.f32.mrb[10].mxu0 }
 0x163   :  { %v1349_v4 = vpop.f32.mrb[11].mxu0 }
 0x164   :  { %v1351_v5 = vpop.f32.mrb[12].mxu1 }
 0x165   :  { %v1355_v7 = vpop.f32.mrb[13].mxu1 }
 0x166   :  { %v1353_v6 = vpop.f32.mrb[12].mxu0 }
 0x167   :  { %v1357_v10 = vpop.f32.mrb[13].mxu0 }
 0x168   :  { %v1359_v11 = vpop.f32.mrb[14].mxu1 }
 0x169   :  { %v1363_v13 = vpop.f32.mrb[15].mxu1 }
 0x16a   :  { %v1361_v12 = vpop.f32.mrb[14].mxu0 }
 0x16b   :  { %v1365_v14 = vpop.f32.mrb[15].mxu0 }
 0x16c   :  { %v336_v15 = vpop.f32.mrb[16].mxu1 }
 0x16d   :  { %v1367_v16 = vadd.f32 %v449_v46, %v336_v15  ;;  %v338_v9 = vpop.f32.mrb[17].mxu1 }
 0x16e   :  { %v497_v17 = vpop.f32.mrb[16].mxu0  ;;  %v1371_v19 = vadd.f32 %v451_v48, %v338_v9  ;;  %v1402_v48 = vstv %s579_s21 }
 0x16f   :  { %v1369_v18 = vsub.f32 %v288_v45, %v497_v17  ;;  %v499_v20 = vpop.f32.mrb[17].mxu0  ;;  %v582_v21 = vmul.f32 %v1367_v16, %v1367_v16 }
 0x170   :  { %v1375_v8 = vsub.f32 %v290_v47, %v499_v20  ;;  %v583_v23 = vmul.f32 %v1371_v19, %v1371_v19  ;;  %v342_v24 = vpop.f32.mrb[18].mxu1 }
 0x171   :  { %v580_v22 = vmul.f32 %v1369_v18, %v1369_v18  ;;  %v562_v26 = vadd.f32 %v455_v50, %v342_v24  ;;  %v344_v28 = vpop.f32.mrb[19].mxu1 }
 0x172   :  { %v581_v25 = vmul.f32 %v1375_v8, %v1375_v8  ;;  %v503_v27 = vpop.f32.mrb[18].mxu0  ;;  %v563_v32 = vadd.f32 %v457_v52, %v344_v28 }
 0x173   :  { %v584_v29 = vadd.f32 %v582_v21, %v580_v22  ;;  %v546_v31 = vsub.f32 %v294_v49, %v503_v27  ;;  %v505_v33 = vpop.f32.mrb[19].mxu0  ;;  %v603_v36 = vmul.f32 %v562_v26, %v1367_v16 }
 0x174   :  { %v585_v34 = vadd.f32 %v583_v23, %v581_v25  ;;  %v547_v37 = vsub.f32 %v296_v51, %v505_v33  ;;  %v604_v41 = vmul.f32 %v563_v32, %v1371_v19  ;;  %v348_v42 = vpop.f32.mrb[20].mxu1 }
 0x175   :  { %v586_v38 = vrot.slane %v584_v29, 4  ;;  %v601_v39 = vmul.f32 %v546_v31, %v1369_v18  ;;  %v564_v45 = vadd.f32 %v461_v54, %v348_v42  ;;  %v350_v47 = vpop.f32.mrb[21].mxu1  ;;  %v719_v54 = vpop.permute.xlu1 %718 }
 0x176   :  { %v592_v43 = vrot.slane %v585_v34, 4  ;;  %v602_v44 = vmul.f32 %v547_v37, %v1375_v8  ;;  %v509_v46 = vpop.f32.mrb[20].mxu0  ;;  %v565_v52 = vadd.f32 %v1325_v56, %v350_v47 }
 0x177   :  { %v587_v49 = vadd.f32 %v586_v38, %v584_v29  ;;  %v605_v50 = vadd.f32 %v603_v36, %v601_v39  ;;  %v548_v51 = vsub.f32 %v1321_v53, %v509_v46  ;;  %v511_v15 = vpop.f32.mrb[21].mxu0  ;;  %v621_v20 = vmul.f32 %v564_v45, %v1367_v16 }
 0x178   :  { %v593_v17 = vadd.f32 %v592_v43, %v585_v34  ;;  %v606_v9 = vadd.f32 %v604_v41, %v602_v44  ;;  %v549_v21 = vsub.f32 %v1323_v55, %v511_v15  ;;  %v622_v25 = vmul.f32 %v565_v52, %v1371_v19  ;;  %v354_v26 = vpop.f32.mrb[22].mxu1  ;;  %v1412_v34 = vpop.permute.xlu0 %666 }
 0x179   :  { %v588_v22 = vrot.slane %v587_v49, 2  ;;  %v607_v23 = vrot.slane %v605_v50, 4  ;;  %v619_v24 = vmul.f32 %v548_v51, %v1369_v18  ;;  %v566_v56 = vadd.f32 %v1329_v58, %v354_v26  ;;  %v356_v31 = vpop.f32.mrb[23].mxu1 }
 0x17a   :  { %v594_v27 = vrot.slane %v593_v17, 2  ;;  %v613_v28 = vrot.slane %v606_v9, 4  ;;  %v620_v53 = vmul.f32 %v549_v21, %v1375_v8  ;;  %v515_v29 = vpop.f32.mrb[22].mxu0  ;;  %v567_v51 = vadd.f32 %v1333_v60, %v356_v31 }
 0x17b   :  { %v589_v32 = vadd.f32 %v588_v22, %v587_v49  ;;  %v608_v33 = vadd.f32 %v607_v23, %v605_v50  ;;  %v623_v55 = vadd.f32 %v621_v20, %v619_v24  ;;  %v550_v36 = vsub.f32 %v1327_v57, %v515_v29  ;;  %v517_v37 = vpop.f32.mrb[23].mxu0  ;;  %v1420_v20 = vpop.permute.xlu1 %837 }
 0x17c   :  { %v595_v38 = vadd.f32 %v594_v27, %v593_v17  ;;  %v614_v39 = vadd.f32 %v613_v28, %v606_v9  ;;  %v624_v41 = vadd.f32 %v622_v25, %v620_v53  ;;  %v639_v42 = vmul.f32 %v566_v56, %v1367_v16  ;;  %v360_v46 = vpop.f32.mrb[24].mxu1  ;;  %v681_v27 = vpop.permute.xlu0 %680 }
 0x17d   :  { %v590_v43 = vrot.slane %v589_v32, 1  ;;  %v609_v44 = vrot.slane %v608_v33, 2  ;;  %v625_v45 = vrot.slane %v623_v55, 4  ;;  %v637_v58 = vmul.f32 %v550_v36, %v1369_v18  ;;  %v1418_v15 = vpop.f32.mrb[25].mxu1 }
 0x17e   :  { %v596_v47 = vrot.slane %v595_v38, 1  ;;  %v615_v49 = vrot.slane %v614_v39, 2  ;;  %v631_v50 = vrot.slane %v624_v41, 4  ;;  %v521_v52 = vpop.f32.mrb[24].mxu0  ;;  %v640_v24 = vmul.f32 %v567_v51, %v1371_v19 }
 0x17f   :  { %v591_v57 = vadd.f32 %v590_v43, %v589_v32  ;;  %v610_v17 = vadd.f32 %v609_v44, %v608_v33  ;;  %v626_v9 = vadd.f32 %v625_v45, %v623_v55  ;;  %v641_v16 = vadd.f32 %v639_v42, %v637_v58  ;;  %v1422_v21 = vpop.f32.mrb[25].mxu0 }
 0x180   :  { %v597_v22 = vadd.f32 %v596_v47, %v595_v38  ;;  %v616_v23 = vadd.f32 %v615_v49, %v614_v39  ;;  %v632_v18 = vadd.f32 %v631_v50, %v624_v41  ;;  %v1428_v53 = vpop.f32.mrb[26].mxu1  ;;  %v551_v32 = vsub.f32 %v1331_v59, %v517_v37  ;;  %v1453_v49 = vpop.permute.xlu1 %870 }
 0x181   :  { %v1426_v25 = vmul.f32 %v1394_v35, %v591_v57  ;;  %v611_v60 = vrot.slane %v610_v17, 1  ;;  %v627_v26 = vrot.slane %v626_v9, 2  ;;  %v643_v28 = vrot.slane %v641_v16, 4  ;;  %v1436_v55 = vpop.f32.mrb[27].mxu1 }
 0x182   :  { %v1431_v56 = vmul.f32 %v1394_v35, %v597_v22  ;;  %v617_v29 = vrot.slane %v616_v23, 1  ;;  %v633_v31 = vrot.slane %v632_v18, 2  ;;  %v1434_v33 = vpop.f32.mrb[26].mxu0 }
 0x183   :  { %v701_v19 = vmul.f32 %v1392_v30, %v1426_v25  ;;  %v612_v36 = vadd.f32 %v611_v60, %v610_v17  ;;  %v1441_v38 = vmul.f32 %v719_v54, %v1426_v25  ;;  %v628_v39 = vadd.f32 %v627_v26, %v626_v9  ;;  %v1443_v41 = vpop.f32.mrb[27].mxu0 }
 0x184   :  { %v702_v42 = vmul.f32 %v1392_v30, %v1431_v56  ;;  %v618_v43 = vadd.f32 %v617_v29, %v616_v23  ;;  %v1448_v59 = vmul.f32 %v719_v54, %v1431_v56  ;;  %v634_v37 = vadd.f32 %v633_v31, %v632_v18  ;;  %v1455_v50 = vpop.f32.mrb[28].mxu1  ;;  %v1473_v29 = vpop.permute.xlu0 %852 }
 0x185   :  { %v658_v44 = vmul.f32 %v1398_v40, %v612_v36  ;;  %v629_v45 = vrot.slane %v628_v39, 1  ;;  %v683_v58 = vmul.f32 %v681_v27, %v1426_v25  ;;  %v684_v47 = vmul.f32 %v681_v27, %v1431_v56  ;;  %v1461_v9 = vpop.f32.mrb[29].mxu1 }
 0x186   :  { %v659_v51 = vmul.f32 %v1398_v40, %v618_v43  ;;  %v635_v57 = vrot.slane %v634_v37, 1  ;;  %v644_v30 = vadd.f32 %v643_v28, %v641_v16  ;;  %v638_v17 = vmul.f32 %v551_v32, %v1375_v8  ;;  %v1459_v54 = vpop.f32.mrb[28].mxu0 }
 0x187   :  { %v703_v22 = vmul.f32 %v1412_v34, %v658_v44  ;;  %v630_v23 = vadd.f32 %v629_v45, %v628_v39  ;;  %v1465_v18 = vadd.f32 %v1337_v62, %v360_v46  ;;  %v1468_v60 = vsub.f32 %v1335_v61, %v521_v52  ;;  %v1470_v26 = vpop.f32.mrb[29].mxu0 }
 0x188   :  { %v704_v27 = vmul.f32 %v1412_v34, %v659_v51  ;;  %v636_v16 = vadd.f32 %v635_v57, %v634_v37  ;;  %v645_v28 = vrot.slane %v644_v30, 2  ;;  %v642_v8 = vadd.f32 %v640_v24, %v638_v17  ;;  %v1480_v61 = vpop.f32.mrb[30].mxu1  ;;  %v737_v57 = vpop.permute.xlu1 %736 }
 0x189   :  { %v705_v31 = vadd.f32 %v703_v22, %v701_v19  ;;  %v656_v32 = vmul.f32 %v1398_v40, %v630_v23  ;;  %v755_v36 = vmul.f32 %v1465_v18, %v1465_v18  ;;  %v753_v62 = vmul.f32 %v1468_v60, %v1468_v60  ;;  %v1485_v24 = vpop.f32.mrb[31].mxu1 }
 0x18a   :  { %v706_v46 = vadd.f32 %v704_v27, %v702_v42  ;;  %v657_v52 = vmul.f32 %v1398_v40, %v636_v16  ;;  %v646_v39 = vadd.f32 %v645_v28, %v644_v30  ;;  %v649_v43 = vrot.slane %v642_v8, 4  ;;  %v1483_v37 = vpop.f32.mrb[30].mxu0 }
 0x18b   :  { %v709_v19 = vrot.slane %v705_v31, 2  ;;  %v685_v44 = vmul.f32 %v1412_v34, %v656_v32  ;;  %v757_v45 = vadd.f32 %v755_v36, %v753_v62  ;;  %v1490_v51 = vadd.f32 %v1341_v0, %v1418_v15  ;;  %v1492_v17 = vpop.f32.mrb[31].mxu0  ;;  %v1507_v32 = vpop.permute.xlu0 %890 }
 0x18c   :  { %v710_v42 = vrot.slane %v706_v46, 2  ;;  %v686_v22 = vmul.f32 %v1412_v34, %v657_v52  ;;  %v647_v30 = vrot.slane %v646_v39, 1  ;;  %v650_v23 = vadd.f32 %v649_v43, %v642_v8 }
 0x18d   :  { %713 = vst [vmem:[%s1654_s5 + $0x10] ss:$-12 sps:$4 sm:$0xc1] %v709_v19   ;;  %v687_v27 = vadd.f32 %v685_v44, %v683_v58  ;;  %v759_v16 = vrot.slane %v757_v45, 4  ;;  %v756_v28 = vmul.f32 %v1490_v51, %v1490_v51  ;;  %v1502_v0 = vsub.f32 %v1339_v63, %v1422_v21 }
 0x18e   :  { %714 = vst [vmem:[%s1654_s5 + $0x18] ss:$-12 sps:$4 sm:$0xc1] %v710_v42   ;;  %v688_v15 = vadd.f32 %v686_v22, %v684_v47  ;;  %v648_v31 = vadd.f32 %v647_v30, %v646_v39  ;;  %v651_v8 = vrot.slane %v650_v23, 2  ;;  %v739_v36 = vmul.f32 %v737_v57, %v1426_v25 }
 0x18f   :  { %v691_v58 = vrot.slane %v687_v27, 5  ;;  %v760_v62 = vadd.f32 %v759_v16, %v757_v45  ;;  %v754_v46 = vmul.f32 %v1502_v0, %v1502_v0  ;;  %v740_v52 = vmul.f32 %v737_v57, %v1431_v56 }
 0x190   :  { %v692_v63 = vrot.slane %v688_v15, 5  ;;  %v661_v21 = vmul.f32 %v1402_v48, %v648_v31  ;;  %v652_v43 = vadd.f32 %v651_v8, %v650_v23  ;;  %v743_v19 = vrot.slane %v739_v36, 4 }
 0x191   :  { %695 = vst [vmem:[%s1654_s5] sm:$0x38] %v691_v58  ;;  %v761_v47 = vrot.slane %v760_v62, 2  ;;  %v758_v39 = vadd.f32 %v756_v28, %v754_v46  ;;  %v744_v44 = vrot.slane %v740_v52, 4  ;;  %v570_v45 = vadd.f32 %v1345_v2, %v1428_v53 }
 0x192   :  { %696 = vst [vmem:[%s1654_s5 + $0x8] sm:$0x38] %v692_v63  ;;  %v723_v57 = vmul.f32 %v1412_v34, %v661_v21  ;;  %v653_v42 = vrot.slane %v652_v43, 1  ;;  %747 = vst [vmem:[%s1654_s5 + $0x10] sm:$0x70] %v743_v19  ;;  %v554_v22 = vsub.f32 %v1343_v1, %v1434_v33  ;;  %v571_v30 = vadd.f32 %v1349_v4, %v1436_v55  ;;  %v673_v33 = vpop.permute.xlu0 %672 }
 0x193   :  { %v762_v23 = vadd.f32 %v761_v47, %v760_v62  ;;  %v765_v27 = vrot.slane %v758_v39, 4  ;;  %748 = vst [vmem:[%s1654_s5 + $0x18] sm:$0x70] %v744_v44  ;;  %v775_v2 = vmul.f32 %v570_v45, %v1465_v18  ;;  %v555_v53 = vsub.f32 %v1347_v3, %v1443_v41 }
 0x194   :  { %v725_v16 = vadd.f32 %v723_v57, %v1441_v38  ;;  %v654_v28 = vadd.f32 %v653_v42, %v652_v43  ;;  %v773_v15 = vmul.f32 %v554_v22, %v1468_v60  ;;  %v776_v1 = vmul.f32 %v571_v30, %v1490_v51 }
 0x195   :  { %v763_v4 = vrot.slane %v762_v23, 1  ;;  %v766_v55 = vadd.f32 %v765_v27, %v758_v39  ;;  %v774_v31 = vmul.f32 %v555_v53, %v1502_v0  ;;  %v669_v8 = vmul.f32 %v1412_v34, %v1426_v25 }
 0x196   :  { %v729_v36 = vrot.slane %v725_v16, 7  ;;  %v662_v58 = vmul.f32 %v1402_v48, %v654_v28  ;;  %v777_v62 = vadd.f32 %v775_v2, %v773_v15  ;;  %v670_v3 = vmul.f32 %v1412_v34, %v1431_v56 }
 0x197   :  { %v767_v38 = vrot.slane %v766_v55, 2  ;;  %v764_v41 = vadd.f32 %v763_v4, %v762_v23  ;;  %v778_v46 = vadd.f32 %v776_v1, %v774_v31  ;;  %v675_v52 = vadd.f32 %v673_v33, %v669_v8 }
 0x198   :  { %733 = vst [vmem:[%s1654_s5 + $0x10] sm:$0xe] %v729_v36  ;;  %v724_v63 = vmul.f32 %v1412_v34, %v662_v58  ;;  %v779_v21 = vrot.slane %v777_v62, 4  ;;  %v676_v43 = vadd.f32 %v673_v33, %v670_v3  ;;  %v572_v25 = vadd.f32 %v1353_v6, %v1455_v50 }
 0x199   :  { %v768_v19 = vadd.f32 %v767_v38, %v766_v55  ;;  %v785_v47 = vrot.slane %v778_v46, 4  ;;  %677 = vst [vmem:[%s1654_s5] sm:$0x7] %v675_v52  ;;  %v556_v56 = vsub.f32 %v1351_v5, %v1459_v54  ;;  %v573_v6 = vadd.f32 %v1357_v10, %v1461_v9 }
 0x19a   :  { %v726_v39 = vadd.f32 %v724_v63, %v1448_v59  ;;  %v780_v44 = vadd.f32 %v779_v21, %v777_v62  ;;  %678 = vst [vmem:[%s1654_s5 + $0x8] sm:$0x7] %v676_v43  ;;  %v793_v34 = vmul.f32 %v572_v25, %v1465_v18  ;;  %v1564_v42 = vmul.f32 %v764_v41, %v1394_v35 }
 0x19b   :  { %v769_v50 = vrot.slane %v768_v19, 1  ;;  %v786_v45 = vadd.f32 %v785_v47, %v778_v46  ;;  %v791_v5 = vmul.f32 %v556_v56, %v1468_v60  ;;  %v794_v30 = vmul.f32 %v573_v6, %v1490_v51 }
 0x19c   :  { %v730_v57 = vrot.slane %v726_v39, 7  ;;  %v781_v22 = vrot.slane %v780_v44, 2  ;;  %v557_v23 = vsub.f32 %v1355_v7, %v1470_v26  ;;  %v574_v27 = vadd.f32 %v1361_v12, %v1480_v61 }
 0x19d   :  { %v770_v59 = vadd.f32 %v769_v50, %v768_v19  ;;  %v787_v54 = vrot.slane %v786_v45, 2  ;;  %v795_v9 = vadd.f32 %v793_v34, %v791_v5  ;;  %v558_v2 = vsub.f32 %v1359_v11, %v1483_v37  ;;  %v909_v37 = vpop.permute.xlu1 %908 }
 0x19e   :  { %734 = vst [vmem:[%s1654_s5 + $0x18] sm:$0xe] %v730_v57  ;;  %v782_v10 = vadd.f32 %v781_v22, %v780_v44  ;;  %v792_v28 = vmul.f32 %v557_v23, %v1502_v0  ;;  %v575_v7 = vadd.f32 %v1365_v14, %v1485_v24  ;;  %v811_v1 = vmul.f32 %v574_v27, %v1465_v18 }
 0x19f   :  { %v1578_v53 = vmul.f32 %v770_v59, %v1394_v35  ;;  %v788_v16 = vadd.f32 %v787_v54, %v786_v45  ;;  %v797_v15 = vrot.slane %v795_v9, 4  ;;  %v809_v33 = vmul.f32 %v558_v2, %v1468_v60 }
 0x1a0   :  { %v783_v26 = vrot.slane %v782_v10, 1  ;;  %v873_v12 = vmul.f32 %v1453_v49, %v1564_v42  ;;  %v796_v11 = vadd.f32 %v794_v30, %v792_v28  ;;  %v812_v24 = vmul.f32 %v575_v7, %v1490_v51 }
 0x1a1   :  { %v789_v61 = vrot.slane %v788_v16, 1  ;;  %v874_v4 = vmul.f32 %v1453_v49, %v1578_v53  ;;  %v798_v55 = vadd.f32 %v797_v15, %v795_v9  ;;  %v813_v31 = vadd.f32 %v811_v1, %v809_v33  ;;  %v844_v25 = vpop.permute.xlu1 %843 }
 0x1a2   :  { %v784_v35 = vadd.f32 %v783_v26, %v782_v10  ;;  %v803_v14 = vrot.slane %v796_v11, 4  ;;  %v559_v18 = vsub.f32 %v1363_v13, %v1492_v17  ;;  %v911_v62 = vmul.f32 %v909_v37, %v1564_v42 }
 0x1a3   :  { %v790_v8 = vadd.f32 %v789_v61, %v788_v16  ;;  %v799_v36 = vrot.slane %v798_v55, 2  ;;  %v815_v58 = vrot.slane %v813_v31, 4  ;;  %v912_v41 = vmul.f32 %v909_v37, %v1578_v53 }
 0x1a4   :  { %v829_v60 = vmul.f32 %v784_v35, %v1398_v40  ;;  %v804_v38 = vadd.f32 %v803_v14, %v796_v11  ;;  %v810_v49 = vmul.f32 %v559_v18, %v1502_v0  ;;  %v915_v63 = vrot.slane %v911_v62, 4 }
 0x1a5   :  { %v830_v3 = vmul.f32 %v790_v8, %v1398_v40  ;;  %v800_v52 = vadd.f32 %v799_v36, %v798_v55  ;;  %v816_v51 = vadd.f32 %v815_v58, %v813_v31  ;;  %v916_v43 = vrot.slane %v912_v41, 4 }
 0x1a6   :  { %v875_v46 = vmul.f32 %v1420_v20, %v829_v60  ;;  %v805_v17 = vrot.slane %v804_v38, 2  ;;  %v814_v21 = vadd.f32 %v812_v24, %v810_v49  ;;  %942 = vst [vmem:[%s1654_s5 + $0x40] sm:$0x70] %v915_v63  ;;  %v840_v0 = vmul.f32 %v1420_v20, %v1564_v42 }
 0x1a7   :  { %v876_v13 = vmul.f32 %v1420_v20, %v830_v3  ;;  %v801_v47 = vrot.slane %v800_v52, 1  ;;  %v817_v56 = vrot.slane %v816_v51, 2  ;;  %943 = vst [vmem:[%s1654_s5 + $0x48] sm:$0x70] %v916_v43  ;;  %v841_v6 = vmul.f32 %v1420_v20, %v1578_v53 }
 0x1a8   :  { %v877_v19 = vadd.f32 %v875_v46, %v873_v12  ;;  %v806_v44 = vadd.f32 %v805_v17, %v804_v38  ;;  %v821_v34 = vrot.slane %v814_v21, 4  ;;  %v846_v22 = vadd.f32 %v844_v25, %v840_v0 }
 0x1a9   :  { %v878_v39 = vadd.f32 %v876_v13, %v874_v4  ;;  %v802_v45 = vadd.f32 %v801_v47, %v800_v52  ;;  %v818_v57 = vadd.f32 %v817_v56, %v816_v51  ;;  %v847_v30 = vadd.f32 %v844_v25, %v841_v6 }
 0x1aa   :  { %v881_v50 = vrot.slane %v877_v19, 2  ;;  %v807_v59 = vrot.slane %v806_v44, 1  ;;  %v822_v54 = vadd.f32 %v821_v34, %v814_v21  ;;  %932 = vst [vmem:[%s1654_s5 + $0x30] sm:$0x7] %v846_v22  ;;  %v855_v2 = vmul.f32 %v1473_v29, %v1564_v42 }
 0x1ab   :  { %v882_v5 = vrot.slane %v878_v39, 2  ;;  %v827_v23 = vmul.f32 %v802_v45, %v1398_v40  ;;  %v819_v10 = vrot.slane %v818_v57, 1  ;;  %933 = vst [vmem:[%s1654_s5 + $0x38] sm:$0x7] %v847_v30  ;;  %v856_v33 = vmul.f32 %v1473_v29, %v1578_v53 }
 0x1ac   :  { %936 = vst [vmem:[%s1654_s5 + $0x40] ss:$-12 sps:$4 sm:$0xc1] %v881_v50   ;;  %v808_v9 = vadd.f32 %v807_v59, %v806_v44  ;;  %v823_v27 = vrot.slane %v822_v54, 2  ;;  %v893_v11 = vmul.f32 %v1507_v32, %v1564_v42  ;;  %v894_v14 = vmul.f32 %v1507_v32, %v1578_v53 }
 0x1ad   :  { %937 = vst [vmem:[%s1654_s5 + $0x48] ss:$-12 sps:$4 sm:$0xc1] %v882_v5   ;;  %v857_v16 = vmul.f32 %v1420_v20, %v827_v23  ;;  %v820_v28 = vadd.f32 %v819_v10, %v818_v57 }
 0x1ae   :  { %v828_v7 = vmul.f32 %v808_v9, %v1398_v40  ;;  %v824_v26 = vadd.f32 %v823_v27, %v822_v54 }
 0x1af   :  { %v859_v15 = vadd.f32 %v857_v16, %v855_v2  ;;  %v831_v1 = vmul.f32 %v820_v28, %v1402_v48 }
 0x1b0   :  { %v858_v12 = vmul.f32 %v1420_v20, %v828_v7  ;;  %v825_v61 = vrot.slane %v824_v26, 1 }
 0x1b1   :  { %v863_v37 = vrot.slane %v859_v15, 5  ;;  %v895_v35 = vmul.f32 %v1420_v20, %v831_v1 }
 0x1b2   :  { %v860_v4 = vadd.f32 %v858_v12, %v856_v33  ;;  %v826_v55 = vadd.f32 %v825_v61, %v824_v26 }
 0x1b3   :  { %934 = vst [vmem:[%s1654_s5 + $0x30] sm:$0x38] %v863_v37  ;;  %v897_v40 = vadd.f32 %v895_v35, %v893_v11 }
 0x1b4   :  { %v864_v31 = vrot.slane %v860_v4, 5  ;;  %v832_v8 = vmul.f32 %v826_v55, %v1402_v48 }
 0x1b5   :  { %v901_v29 = vrot.slane %v897_v40, 7 }
 0x1b6   :  { %935 = vst [vmem:[%s1654_s5 + $0x38] sm:$0x38] %v864_v31  ;;  %v896_v42 = vmul.f32 %v1420_v20, %v832_v8 }
 0x1b7   :  { %940 = vst [vmem:[%s1654_s5 + $0x40] sm:$0xe] %v901_v29 }
 0x1b8   :  { %v898_v24 = vadd.f32 %v896_v42, %v894_v14 }
 0x1ba   :  { %v902_v18 = vrot.slane %v898_v24, 7 }
 0x1bc   :  { %941 = vst [vmem:[%s1654_s5 + $0x48] sm:$0xe] %v902_v18 }
 0x1bd   :  { %929 = vsyncpa [#allocation4], 1 }
 0x1be   :  { %930 = vsyncpa [#allocation6], 1 }

</bundles_post_ra>
